<compile_context>
chip_gen: v5e
topology: v5e:2x2
jax: 0.10.0
libtpu: 0.0.40
codegen_flags: <defaults>
</compile_context>

<pallas_src>
import math
from functools import partial

import jax
import jax.numpy as jnp
from jax.experimental import pallas as pl
from jax.experimental.pallas import tpu as pltpu

# Small, module-consistent shapes.
B, S, D, H, DFF = 2, 8, 32, 4, 64
DH = D // H
EPS = 1e-5          # nn.LayerNorm default
NEG_INF = -1e9      # masked_fill value in the reference attention


def encoder_layer_kernel(x_ref, mask_ref,
                         wqkv_ref, bqkv_ref, wo_ref, bo_ref,
                         g1_ref, be1_ref,
                         w1_ref, b1_ref, w2_ref, b2_ref,
                         g2_ref, be2_ref,
                         out_ref, *, bb):
    """Processes `bb` batch elements per grid step (bb = 1 or B)."""

    def matmul(a_f32, w_ref):
        # bf16 operands, f32 accumulation (MXU-native on v5e/v6e/v7x).
        return jnp.dot(a_f32.astype(jnp.bfloat16), w_ref[...],
                       preferred_element_type=jnp.float32)

    def layernorm(y, g_ref, b_ref):
        mu = jnp.mean(y, axis=-1, keepdims=True)
        var = jnp.mean((y - mu) ** 2, axis=-1, keepdims=True)
        return (y - mu) * jax.lax.rsqrt(var + EPS) * g_ref[...] + b_ref[...]

    for b in range(bb):            # static unroll; bb == 1 when grid covers batch
        x = x_ref[b]               # (S, D) f32
        m = mask_ref[b]            # (S, S) f32, 1.0 = attend, 0.0 = mask

        # Additive mask bias, computed once (hoisted out of the head loop).
        mbias = jnp.where(m > 0, 0.0, NEG_INF)

        # ---- fused Q/K/V projection: one (S, D) @ (D, 3D) matmul ----
        qkv = matmul(x, wqkv_ref) + bqkv_ref[...]     # (S, 3D) f32
        q = qkv[:, 0 * D:1 * D]                       # scale already folded in
        k = qkv[:, 1 * D:2 * D]
        v = qkv[:, 2 * D:3 * D]

        # ---- multi-head attention, accumulating straight into Wo projection ----
        attn = jnp.zeros((S, D), jnp.float32)
        for h in range(H):                            # static unroll over heads
            sl = slice(h * DH, (h + 1) * DH)
            qh = q[:, sl].astype(jnp.bfloat16)        # (S, DH)
            kh = k[:, sl].astype(jnp.bfloat16)
            vh = v[:, sl].astype(jnp.bfloat16)

            s = jax.lax.dot_general(qh, kh, (((1,), (1,)), ((), ())),
                                    preferred_element_type=jnp.float32)  # (S, S)
            s = s + mbias
            s = s - jnp.max(s, axis=-1, keepdims=True)
            p = jnp.exp(s)
            p = p * pl.reciprocal(jnp.sum(p, axis=-1, keepdims=True), approx=True)

            ctx = jnp.dot(p.astype(jnp.bfloat16), vh,
                          preferred_element_type=jnp.float32)            # (S, DH)
            # Accumulate this head's contribution through its slice of Wo
            # (replaces the head concat + single big output matmul).
            attn = attn + jnp.dot(ctx.astype(jnp.bfloat16), wo_ref[sl, :],
                                  preferred_element_type=jnp.float32)    # (S, D)
        attn = attn + bo_ref[...]

        # ---- AddAndNorm 1: dropout(LayerNorm(x + attn)); dropout = identity (eval)
        # TODO(synk): training-mode dropout not implemented (eval semantics only).
        y = layernorm(x + attn, g1_ref, be1_ref)

        # ---- position-wise feed-forward ----
        h1 = jnp.maximum(matmul(y, w1_ref) + b1_ref[...], 0.0)   # ReLU
        ff = matmul(h1, w2_ref) + b2_ref[...]

        # ---- AddAndNorm 2 ----
        out_ref[b] = layernorm(y + ff, g2_ref, be2_ref)


def _tensorcores_per_chip():
    """Best-effort TC count per chip; falls back to 1 (collapsed grid)."""
    try:
        kind = jax.devices()[0].device_kind.lower()
    except Exception:
        return 1
    return 2 if ("v7" in kind or "tpu7" in kind) else 1


def encoder_layer(x, mask, params, *, batch_block=None):
    if batch_block is None:
        # v7x: 2 TensorCores -> keep batch as a parallel grid axis.
        # v5e/v6e: single TC -> collapse the grid (grid steps are pure overhead).
        batch_block = 1 if _tensorcores_per_chip() > 1 else B
    grid = (B // batch_block,)

    # Bind ndim as a default arg (fixes the late-binding closure).
    param_specs = [pl.BlockSpec(p.shape, lambda b, nd=p.ndim: (0,) * nd)
                   for p in params]
    in_specs = [
        pl.BlockSpec((batch_block, S, D), lambda b: (b, 0, 0)),   # x
        pl.BlockSpec((batch_block, S, S), lambda b: (b, 0, 0)),   # mask
    ] + param_specs
    out_spec = pl.BlockSpec((batch_block, S, D), lambda b: (b, 0, 0))

    kernel = partial(encoder_layer_kernel, bb=batch_block)

    return pl.pallas_call(
        kernel,
        out_shape=jax.ShapeDtypeStruct((B, S, D), jnp.float32),
        grid_spec=pltpu.PrefetchScalarGridSpec(
            num_scalar_prefetch=0,
            grid=grid,
            in_specs=in_specs,
            out_specs=out_spec,
        ),
        compiler_params=pltpu.CompilerParams(dimension_semantics=("parallel",)),
    )(x, mask, *params)


def init_params(key):
    ks = jax.random.split(key, 8)
    f32, bf16 = jnp.float32, jnp.bfloat16

    def lin_w(k, fan_in, fan_out):
        return jax.random.normal(k, (fan_in, fan_out), f32) / math.sqrt(fan_in)

    # Fold the 1/sqrt(DH) attention scale into Wq (bq is zero, so no bias fold
    # is needed to preserve semantics).
    wq = lin_w(ks[0], D, D) * (1.0 / math.sqrt(DH))
    wk = lin_w(ks[1], D, D)
    wv = lin_w(ks[2], D, D)
    wqkv = jnp.concatenate([wq, wk, wv], axis=1).astype(bf16)   # (D, 3D)
    bqkv = jnp.zeros((1, 3 * D), f32)

    wo = lin_w(ks[3], D, D).astype(bf16)
    bo = jnp.zeros((1, D), f32)

    g1, be1 = jnp.ones((1, D), f32), jnp.zeros((1, D), f32)

    w1 = lin_w(ks[4], D, DFF).astype(bf16)
    b1 = jnp.zeros((1, DFF), f32)
    w2 = lin_w(ks[5], DFF, D).astype(bf16)
    b2 = jnp.zeros((1, D), f32)

    g2, be2 = jnp.ones((1, D), f32), jnp.zeros((1, D), f32)

    return [wqkv, bqkv, wo, bo,
            g1, be1, w1, b1, w2, b2, g2, be2]


if __name__ == "__main__":
    key = jax.random.PRNGKey(0)
    kx, kp = jax.random.split(key)

    x = jax.random.normal(kx, (B, S, D), jnp.float32)
    # Mask: batch 0 attends everywhere; batch 1 masks the last two key positions.
    mask = jnp.ones((B, S, S), jnp.float32)
    mask = mask.at[1, :, S - 2:].set(0.0)

    params = init_params(kp)

    out = encoder_layer(x, mask, params)
    out = jax.block_until_ready(out)

    assert out.shape == (B, S, D) and out.dtype == jnp.float32
    assert bool(jnp.all(jnp.isfinite(out)))
    print("KERNEL_OK")
</pallas_src>

<mosaic_0001>
module attributes {stable_mosaic.version = 11 : i64} {
  func.func @encoder_layer_kernel(%arg0: i32, %arg1: memref<2x8x32xf32, #tpu.memory_space<vmem>>, %arg2: memref<2x8x8xf32, #tpu.memory_space<vmem>>, %arg3: memref<32x96xbf16, #tpu.memory_space<vmem>>, %arg4: memref<1x96xf32, #tpu.memory_space<vmem>>, %arg5: memref<32x32xbf16, #tpu.memory_space<vmem>>, %arg6: memref<1x32xf32, #tpu.memory_space<vmem>>, %arg7: memref<1x32xf32, #tpu.memory_space<vmem>>, %arg8: memref<1x32xf32, #tpu.memory_space<vmem>>, %arg9: memref<32x64xbf16, #tpu.memory_space<vmem>>, %arg10: memref<1x64xf32, #tpu.memory_space<vmem>>, %arg11: memref<64x32xbf16, #tpu.memory_space<vmem>>, %arg12: memref<1x32xf32, #tpu.memory_space<vmem>>, %arg13: memref<1x32xf32, #tpu.memory_space<vmem>>, %arg14: memref<1x32xf32, #tpu.memory_space<vmem>>, %arg15: memref<2x8x32xf32, #tpu.memory_space<vmem>>) attributes {dimension_semantics = [#tpu.dimension_semantics<parallel>], iteration_bounds = array<i64: 1>, scalar_prefetch = 0 : i64, scratch_operands = 0 : i64, tpu.core_type = #tpu.core_type<tc>, window_params = [{transform_indices = @transform_0, window_bounds = array<i64: 2, 8, 32>}, {transform_indices = @transform_1, window_bounds = array<i64: 2, 8, 8>}, {pipeline_mode = #tpu.pipeline_mode<synchronous>, transform_indices = @transform_2, window_bounds = array<i64: 32, 96>}, {pipeline_mode = #tpu.pipeline_mode<synchronous>, transform_indices = @transform_3, window_bounds = array<i64: 1, 96>}, {pipeline_mode = #tpu.pipeline_mode<synchronous>, transform_indices = @transform_4, window_bounds = array<i64: 32, 32>}, {pipeline_mode = #tpu.pipeline_mode<synchronous>, transform_indices = @transform_5, window_bounds = array<i64: 1, 32>}, {pipeline_mode = #tpu.pipeline_mode<synchronous>, transform_indices = @transform_6, window_bounds = array<i64: 1, 32>}, {pipeline_mode = #tpu.pipeline_mode<synchronous>, transform_indices = @transform_7, window_bounds = array<i64: 1, 32>}, {pipeline_mode = #tpu.pipeline_mode<synchronous>, transform_indices = @transform_8, window_bounds = array<i64: 32, 64>}, {pipeline_mode = #tpu.pipeline_mode<synchronous>, transform_indices = @transform_9, window_bounds = array<i64: 1, 64>}, {pipeline_mode = #tpu.pipeline_mode<synchronous>, transform_indices = @transform_10, window_bounds = array<i64: 64, 32>}, {pipeline_mode = #tpu.pipeline_mode<synchronous>, transform_indices = @transform_11, window_bounds = array<i64: 1, 32>}, {pipeline_mode = #tpu.pipeline_mode<synchronous>, transform_indices = @transform_12, window_bounds = array<i64: 1, 32>}, {pipeline_mode = #tpu.pipeline_mode<synchronous>, transform_indices = @transform_13, window_bounds = array<i64: 1, 32>}, {transform_indices = @transform_14, window_bounds = array<i64: 2, 8, 32>}]} {
    %c0 = arith.constant 0 : index
    %c0_0 = arith.constant 0 : index
    %c0_1 = arith.constant 0 : index
    %0 = vector.load %arg1[%c0, %c0_0, %c0_1] : memref<2x8x32xf32, #tpu.memory_space<vmem>>, vector<1x8x32xf32>
    %1 = vector.shape_cast %0 : vector<1x8x32xf32> to vector<8x32xf32>
    %c0_2 = arith.constant 0 : index
    %c0_3 = arith.constant 0 : index
    %c0_4 = arith.constant 0 : index
    %2 = vector.load %arg2[%c0_2, %c0_3, %c0_4] : memref<2x8x8xf32, #tpu.memory_space<vmem>>, vector<1x8x8xf32>
    %3 = vector.shape_cast %2 : vector<1x8x8xf32> to vector<8x8xf32>
    %cst = arith.constant 0.000000e+00 : f32
    %4 = vector.broadcast %cst : f32 to vector<8x8xf32>
    %5 = arith.cmpf ogt, %3, %4 : vector<8x8xf32>
    %cst_5 = arith.constant 0.000000e+00 : f32
    %cst_6 = arith.constant -1.000000e+09 : f32
    %6 = vector.broadcast %cst_5 : f32 to vector<8x8xf32>
    %7 = vector.broadcast %cst_6 : f32 to vector<8x8xf32>
    %8 = arith.select %5, %6, %7 : vector<8x8xi1>, vector<8x8xf32>
    %9 = arith.truncf %1 : vector<8x32xf32> to vector<8x32xbf16>
    %c0_7 = arith.constant 0 : index
    %c0_8 = arith.constant 0 : index
    %10 = vector.load %arg3[%c0_7, %c0_8] : memref<32x96xbf16, #tpu.memory_space<vmem>>, vector<32x96xbf16>
    %cst_9 = arith.constant dense<0.000000e+00> : vector<8x96xf32>
    %11 = tpu.matmul %9, %10, %cst_9 {dimension_numbers = #tpu.dot_dimension_numbers<[1], [0], [0], [1], [0, 0, 1, 1], [], []>} : vector<8x32xbf16>, vector<32x96xbf16>, vector<8x96xf32> -> vector<8x96xf32>
    %c0_10 = arith.constant 0 : index
    %c0_11 = arith.constant 0 : index
    %12 = vector.load %arg4[%c0_10, %c0_11] : memref<1x96xf32, #tpu.memory_space<vmem>>, vector<1x96xf32>
    %13 = vector.broadcast %12 : vector<1x96xf32> to vector<8x96xf32>
    %14 = arith.addf %11, %13 : vector<8x96xf32>
    %15 = vector.extract_strided_slice %14 {offsets = [0, 0], sizes = [8, 32], strides = [1, 1]} : vector<8x96xf32> to vector<8x32xf32>
    %16 = vector.extract_strided_slice %14 {offsets = [0, 32], sizes = [8, 32], strides = [1, 1]} : vector<8x96xf32> to vector<8x32xf32>
    %17 = vector.extract_strided_slice %14 {offsets = [0, 64], sizes = [8, 32], strides = [1, 1]} : vector<8x96xf32> to vector<8x32xf32>
    %cst_12 = arith.constant 0.000000e+00 : f32
    %18 = vector.broadcast %cst_12 : f32 to vector<8x32xf32>
    %19 = vector.extract_strided_slice %15 {offsets = [0, 0], sizes = [8, 8], strides = [1, 1]} : vector<8x32xf32> to vector<8x8xf32>
    %20 = arith.truncf %19 : vector<8x8xf32> to vector<8x8xbf16>
    %21 = vector.extract_strided_slice %16 {offsets = [0, 0], sizes = [8, 8], strides = [1, 1]} : vector<8x32xf32> to vector<8x8xf32>
    %22 = arith.truncf %21 : vector<8x8xf32> to vector<8x8xbf16>
    %23 = vector.extract_strided_slice %17 {offsets = [0, 0], sizes = [8, 8], strides = [1, 1]} : vector<8x32xf32> to vector<8x8xf32>
    %24 = arith.truncf %23 : vector<8x8xf32> to vector<8x8xbf16>
    %cst_13 = arith.constant dense<0.000000e+00> : vector<8x8xf32>
    %25 = tpu.matmul %20, %22, %cst_13 {dimension_numbers = #tpu.dot_dimension_numbers<[1], [1], [0], [0], [0, 0, 1, 0], [], []>} : vector<8x8xbf16>, vector<8x8xbf16>, vector<8x8xf32> -> vector<8x8xf32>
    %26 = arith.addf %25, %8 : vector<8x8xf32>
    %cst_14 = arith.constant dense<0xFF800000> : vector<8xf32>
    %27 = vector.multi_reduction <maximumf>, %26, %cst_14 [1] : vector<8x8xf32> to vector<8xf32>
    %28 = vector.shape_cast %27 : vector<8xf32> to vector<8x1xf32>
    %29 = vector.broadcast %28 : vector<8x1xf32> to vector<8x8xf32>
    %30 = arith.subf %26, %29 : vector<8x8xf32>
    %31 = math.exp %30 : vector<8x8xf32>
    %cst_15 = arith.constant dense<0.000000e+00> : vector<8xf32>
    %32 = vector.multi_reduction <add>, %31, %cst_15 [1] : vector<8x8xf32> to vector<8xf32>
    %33 = vector.shape_cast %32 : vector<8xf32> to vector<8x1xf32>
    %34 = tpu.reciprocal %33 {approx = true} : vector<8x1xf32> -> vector<8x1xf32>
    %35 = vector.broadcast %34 : vector<8x1xf32> to vector<8x8xf32>
    %36 = arith.mulf %31, %35 : vector<8x8xf32>
    %37 = arith.truncf %36 : vector<8x8xf32> to vector<8x8xbf16>
    %cst_16 = arith.constant dense<0.000000e+00> : vector<8x8xf32>
    %38 = tpu.matmul %37, %24, %cst_16 {dimension_numbers = #tpu.dot_dimension_numbers<[1], [0], [0], [1], [0, 0, 1, 1], [], []>} : vector<8x8xbf16>, vector<8x8xbf16>, vector<8x8xf32> -> vector<8x8xf32>
    %39 = arith.truncf %38 : vector<8x8xf32> to vector<8x8xbf16>
    %c0_17 = arith.constant 0 : index
    %c0_18 = arith.constant 0 : index
    %40 = vector.load %arg5[%c0_17, %c0_18] : memref<32x32xbf16, #tpu.memory_space<vmem>>, vector<8x32xbf16>
    %cst_19 = arith.constant dense<0.000000e+00> : vector<8x32xf32>
    %41 = tpu.matmul %39, %40, %cst_19 {dimension_numbers = #tpu.dot_dimension_numbers<[1], [0], [0], [1], [0, 0, 1, 1], [], []>} : vector<8x8xbf16>, vector<8x32xbf16>, vector<8x32xf32> -> vector<8x32xf32>
    %42 = arith.addf %18, %41 : vector<8x32xf32>
    %43 = vector.extract_strided_slice %15 {offsets = [0, 8], sizes = [8, 8], strides = [1, 1]} : vector<8x32xf32> to vector<8x8xf32>
    %44 = arith.truncf %43 : vector<8x8xf32> to vector<8x8xbf16>
    %45 = vector.extract_strided_slice %16 {offsets = [0, 8], sizes = [8, 8], strides = [1, 1]} : vector<8x32xf32> to vector<8x8xf32>
    %46 = arith.truncf %45 : vector<8x8xf32> to vector<8x8xbf16>
    %47 = vector.extract_strided_slice %17 {offsets = [0, 8], sizes = [8, 8], strides = [1, 1]} : vector<8x32xf32> to vector<8x8xf32>
    %48 = arith.truncf %47 : vector<8x8xf32> to vector<8x8xbf16>
    %cst_20 = arith.constant dense<0.000000e+00> : vector<8x8xf32>
    %49 = tpu.matmul %44, %46, %cst_20 {dimension_numbers = #tpu.dot_dimension_numbers<[1], [1], [0], [0], [0, 0, 1, 0], [], []>} : vector<8x8xbf16>, vector<8x8xbf16>, vector<8x8xf32> -> vector<8x8xf32>
    %50 = arith.addf %49, %8 : vector<8x8xf32>
    %cst_21 = arith.constant dense<0xFF800000> : vector<8xf32>
    %51 = vector.multi_reduction <maximumf>, %50, %cst_21 [1] : vector<8x8xf32> to vector<8xf32>
    %52 = vector.shape_cast %51 : vector<8xf32> to vector<8x1xf32>
    %53 = vector.broadcast %52 : vector<8x1xf32> to vector<8x8xf32>
    %54 = arith.subf %50, %53 : vector<8x8xf32>
    %55 = math.exp %54 : vector<8x8xf32>
    %cst_22 = arith.constant dense<0.000000e+00> : vector<8xf32>
    %56 = vector.multi_reduction <add>, %55, %cst_22 [1] : vector<8x8xf32> to vector<8xf32>
    %57 = vector.shape_cast %56 : vector<8xf32> to vector<8x1xf32>
    %58 = tpu.reciprocal %57 {approx = true} : vector<8x1xf32> -> vector<8x1xf32>
    %59 = vector.broadcast %58 : vector<8x1xf32> to vector<8x8xf32>
    %60 = arith.mulf %55, %59 : vector<8x8xf32>
    %61 = arith.truncf %60 : vector<8x8xf32> to vector<8x8xbf16>
    %cst_23 = arith.constant dense<0.000000e+00> : vector<8x8xf32>
    %62 = tpu.matmul %61, %48, %cst_23 {dimension_numbers = #tpu.dot_dimension_numbers<[1], [0], [0], [1], [0, 0, 1, 1], [], []>} : vector<8x8xbf16>, vector<8x8xbf16>, vector<8x8xf32> -> vector<8x8xf32>
    %63 = arith.truncf %62 : vector<8x8xf32> to vector<8x8xbf16>
    %c8 = arith.constant 8 : index
    %c0_24 = arith.constant 0 : index
    %64 = vector.load %arg5[%c8, %c0_24] : memref<32x32xbf16, #tpu.memory_space<vmem>>, vector<8x32xbf16>
    %cst_25 = arith.constant dense<0.000000e+00> : vector<8x32xf32>
    %65 = tpu.matmul %63, %64, %cst_25 {dimension_numbers = #tpu.dot_dimension_numbers<[1], [0], [0], [1], [0, 0, 1, 1], [], []>} : vector<8x8xbf16>, vector<8x32xbf16>, vector<8x32xf32> -> vector<8x32xf32>
    %66 = arith.addf %42, %65 : vector<8x32xf32>
    %67 = vector.extract_strided_slice %15 {offsets = [0, 16], sizes = [8, 8], strides = [1, 1]} : vector<8x32xf32> to vector<8x8xf32>
    %68 = arith.truncf %67 : vector<8x8xf32> to vector<8x8xbf16>
    %69 = vector.extract_strided_slice %16 {offsets = [0, 16], sizes = [8, 8], strides = [1, 1]} : vector<8x32xf32> to vector<8x8xf32>
    %70 = arith.truncf %69 : vector<8x8xf32> to vector<8x8xbf16>
    %71 = vector.extract_strided_slice %17 {offsets = [0, 16], sizes = [8, 8], strides = [1, 1]} : vector<8x32xf32> to vector<8x8xf32>
    %72 = arith.truncf %71 : vector<8x8xf32> to vector<8x8xbf16>
    %cst_26 = arith.constant dense<0.000000e+00> : vector<8x8xf32>
    %73 = tpu.matmul %68, %70, %cst_26 {dimension_numbers = #tpu.dot_dimension_numbers<[1], [1], [0], [0], [0, 0, 1, 0], [], []>} : vector<8x8xbf16>, vector<8x8xbf16>, vector<8x8xf32> -> vector<8x8xf32>
    %74 = arith.addf %73, %8 : vector<8x8xf32>
    %cst_27 = arith.constant dense<0xFF800000> : vector<8xf32>
    %75 = vector.multi_reduction <maximumf>, %74, %cst_27 [1] : vector<8x8xf32> to vector<8xf32>
    %76 = vector.shape_cast %75 : vector<8xf32> to vector<8x1xf32>
    %77 = vector.broadcast %76 : vector<8x1xf32> to vector<8x8xf32>
    %78 = arith.subf %74, %77 : vector<8x8xf32>
    %79 = math.exp %78 : vector<8x8xf32>
    %cst_28 = arith.constant dense<0.000000e+00> : vector<8xf32>
    %80 = vector.multi_reduction <add>, %79, %cst_28 [1] : vector<8x8xf32> to vector<8xf32>
    %81 = vector.shape_cast %80 : vector<8xf32> to vector<8x1xf32>
    %82 = tpu.reciprocal %81 {approx = true} : vector<8x1xf32> -> vector<8x1xf32>
    %83 = vector.broadcast %82 : vector<8x1xf32> to vector<8x8xf32>
    %84 = arith.mulf %79, %83 : vector<8x8xf32>
    %85 = arith.truncf %84 : vector<8x8xf32> to vector<8x8xbf16>
    %cst_29 = arith.constant dense<0.000000e+00> : vector<8x8xf32>
    %86 = tpu.matmul %85, %72, %cst_29 {dimension_numbers = #tpu.dot_dimension_numbers<[1], [0], [0], [1], [0, 0, 1, 1], [], []>} : vector<8x8xbf16>, vector<8x8xbf16>, vector<8x8xf32> -> vector<8x8xf32>
    %87 = arith.truncf %86 : vector<8x8xf32> to vector<8x8xbf16>
    %c16 = arith.constant 16 : index
    %c0_30 = arith.constant 0 : index
    %88 = vector.load %arg5[%c16, %c0_30] : memref<32x32xbf16, #tpu.memory_space<vmem>>, vector<8x32xbf16>
    %cst_31 = arith.constant dense<0.000000e+00> : vector<8x32xf32>
    %89 = tpu.matmul %87, %88, %cst_31 {dimension_numbers = #tpu.dot_dimension_numbers<[1], [0], [0], [1], [0, 0, 1, 1], [], []>} : vector<8x8xbf16>, vector<8x32xbf16>, vector<8x32xf32> -> vector<8x32xf32>
    %90 = arith.addf %66, %89 : vector<8x32xf32>
    %91 = vector.extract_strided_slice %15 {offsets = [0, 24], sizes = [8, 8], strides = [1, 1]} : vector<8x32xf32> to vector<8x8xf32>
    %92 = arith.truncf %91 : vector<8x8xf32> to vector<8x8xbf16>
    %93 = vector.extract_strided_slice %16 {offsets = [0, 24], sizes = [8, 8], strides = [1, 1]} : vector<8x32xf32> to vector<8x8xf32>
    %94 = arith.truncf %93 : vector<8x8xf32> to vector<8x8xbf16>
    %95 = vector.extract_strided_slice %17 {offsets = [0, 24], sizes = [8, 8], strides = [1, 1]} : vector<8x32xf32> to vector<8x8xf32>
    %96 = arith.truncf %95 : vector<8x8xf32> to vector<8x8xbf16>
    %cst_32 = arith.constant dense<0.000000e+00> : vector<8x8xf32>
    %97 = tpu.matmul %92, %94, %cst_32 {dimension_numbers = #tpu.dot_dimension_numbers<[1], [1], [0], [0], [0, 0, 1, 0], [], []>} : vector<8x8xbf16>, vector<8x8xbf16>, vector<8x8xf32> -> vector<8x8xf32>
    %98 = arith.addf %97, %8 : vector<8x8xf32>
    %cst_33 = arith.constant dense<0xFF800000> : vector<8xf32>
    %99 = vector.multi_reduction <maximumf>, %98, %cst_33 [1] : vector<8x8xf32> to vector<8xf32>
    %100 = vector.shape_cast %99 : vector<8xf32> to vector<8x1xf32>
    %101 = vector.broadcast %100 : vector<8x1xf32> to vector<8x8xf32>
    %102 = arith.subf %98, %101 : vector<8x8xf32>
    %103 = math.exp %102 : vector<8x8xf32>
    %cst_34 = arith.constant dense<0.000000e+00> : vector<8xf32>
    %104 = vector.multi_reduction <add>, %103, %cst_34 [1] : vector<8x8xf32> to vector<8xf32>
    %105 = vector.shape_cast %104 : vector<8xf32> to vector<8x1xf32>
    %106 = tpu.reciprocal %105 {approx = true} : vector<8x1xf32> -> vector<8x1xf32>
    %107 = vector.broadcast %106 : vector<8x1xf32> to vector<8x8xf32>
    %108 = arith.mulf %103, %107 : vector<8x8xf32>
    %109 = arith.truncf %108 : vector<8x8xf32> to vector<8x8xbf16>
    %cst_35 = arith.constant dense<0.000000e+00> : vector<8x8xf32>
    %110 = tpu.matmul %109, %96, %cst_35 {dimension_numbers = #tpu.dot_dimension_numbers<[1], [0], [0], [1], [0, 0, 1, 1], [], []>} : vector<8x8xbf16>, vector<8x8xbf16>, vector<8x8xf32> -> vector<8x8xf32>
    %111 = arith.truncf %110 : vector<8x8xf32> to vector<8x8xbf16>
    %c24 = arith.constant 24 : index
    %c0_36 = arith.constant 0 : index
    %112 = vector.load %arg5[%c24, %c0_36] : memref<32x32xbf16, #tpu.memory_space<vmem>>, vector<8x32xbf16>
    %cst_37 = arith.constant dense<0.000000e+00> : vector<8x32xf32>
    %113 = tpu.matmul %111, %112, %cst_37 {dimension_numbers = #tpu.dot_dimension_numbers<[1], [0], [0], [1], [0, 0, 1, 1], [], []>} : vector<8x8xbf16>, vector<8x32xbf16>, vector<8x32xf32> -> vector<8x32xf32>
    %114 = arith.addf %90, %113 : vector<8x32xf32>
    %c0_38 = arith.constant 0 : index
    %c0_39 = arith.constant 0 : index
    %115 = vector.load %arg6[%c0_38, %c0_39] : memref<1x32xf32, #tpu.memory_space<vmem>>, vector<1x32xf32>
    %116 = vector.broadcast %115 : vector<1x32xf32> to vector<8x32xf32>
    %117 = arith.addf %114, %116 : vector<8x32xf32>
    %118 = arith.addf %1, %117 : vector<8x32xf32>
    %cst_40 = arith.constant dense<0.000000e+00> : vector<8xf32>
    %119 = vector.multi_reduction <add>, %118, %cst_40 [1] : vector<8x32xf32> to vector<8xf32>
    %120 = vector.shape_cast %119 : vector<8xf32> to vector<8x1xf32>
    %cst_41 = arith.constant 3.200000e+01 : f32
    %121 = vector.broadcast %cst_41 : f32 to vector<8x1xf32>
    %122 = arith.divf %120, %121 : vector<8x1xf32>
    %123 = vector.broadcast %122 : vector<8x1xf32> to vector<8x32xf32>
    %124 = arith.subf %118, %123 : vector<8x32xf32>
    %125 = arith.mulf %124, %124 : vector<8x32xf32>
    %cst_42 = arith.constant dense<0.000000e+00> : vector<8xf32>
    %126 = vector.multi_reduction <add>, %125, %cst_42 [1] : vector<8x32xf32> to vector<8xf32>
    %127 = vector.shape_cast %126 : vector<8xf32> to vector<8x1xf32>
    %cst_43 = arith.constant 3.200000e+01 : f32
    %128 = vector.broadcast %cst_43 : f32 to vector<8x1xf32>
    %129 = arith.divf %127, %128 : vector<8x1xf32>
    %130 = vector.broadcast %122 : vector<8x1xf32> to vector<8x32xf32>
    %131 = arith.subf %118, %130 : vector<8x32xf32>
    %cst_44 = arith.constant 9.99999974E-6 : f32
    %132 = vector.broadcast %cst_44 : f32 to vector<8x1xf32>
    %133 = arith.addf %129, %132 : vector<8x1xf32>
    %134 = math.rsqrt %133 : vector<8x1xf32>
    %135 = vector.broadcast %134 : vector<8x1xf32> to vector<8x32xf32>
    %136 = arith.mulf %131, %135 : vector<8x32xf32>
    %c0_45 = arith.constant 0 : index
    %c0_46 = arith.constant 0 : index
    %137 = vector.load %arg7[%c0_45, %c0_46] : memref<1x32xf32, #tpu.memory_space<vmem>>, vector<1x32xf32>
    %138 = vector.broadcast %137 : vector<1x32xf32> to vector<8x32xf32>
    %139 = arith.mulf %136, %138 : vector<8x32xf32>
    %c0_47 = arith.constant 0 : index
    %c0_48 = arith.constant 0 : index
    %140 = vector.load %arg8[%c0_47, %c0_48] : memref<1x32xf32, #tpu.memory_space<vmem>>, vector<1x32xf32>
    %141 = vector.broadcast %140 : vector<1x32xf32> to vector<8x32xf32>
    %142 = arith.addf %139, %141 : vector<8x32xf32>
    %143 = arith.truncf %142 : vector<8x32xf32> to vector<8x32xbf16>
    %c0_49 = arith.constant 0 : index
    %c0_50 = arith.constant 0 : index
    %144 = vector.load %arg9[%c0_49, %c0_50] : memref<32x64xbf16, #tpu.memory_space<vmem>>, vector<32x64xbf16>
    %cst_51 = arith.constant dense<0.000000e+00> : vector<8x64xf32>
    %145 = tpu.matmul %143, %144, %cst_51 {dimension_numbers = #tpu.dot_dimension_numbers<[1], [0], [0], [1], [0, 0, 1, 1], [], []>} : vector<8x32xbf16>, vector<32x64xbf16>, vector<8x64xf32> -> vector<8x64xf32>
    %c0_52 = arith.constant 0 : index
    %c0_53 = arith.constant 0 : index
    %146 = vector.load %arg10[%c0_52, %c0_53] : memref<1x64xf32, #tpu.memory_space<vmem>>, vector<1x64xf32>
    %147 = vector.broadcast %146 : vector<1x64xf32> to vector<8x64xf32>
    %148 = arith.addf %145, %147 : vector<8x64xf32>
    %cst_54 = arith.constant 0.000000e+00 : f32
    %149 = vector.broadcast %cst_54 : f32 to vector<8x64xf32>
    %150 = arith.maximumf %148, %149 : vector<8x64xf32>
    %151 = arith.truncf %150 : vector<8x64xf32> to vector<8x64xbf16>
    %c0_55 = arith.constant 0 : index
    %c0_56 = arith.constant 0 : index
    %152 = vector.load %arg11[%c0_55, %c0_56] : memref<64x32xbf16, #tpu.memory_space<vmem>>, vector<64x32xbf16>
    %cst_57 = arith.constant dense<0.000000e+00> : vector<8x32xf32>
    %153 = tpu.matmul %151, %152, %cst_57 {dimension_numbers = #tpu.dot_dimension_numbers<[1], [0], [0], [1], [0, 0, 1, 1], [], []>} : vector<8x64xbf16>, vector<64x32xbf16>, vector<8x32xf32> -> vector<8x32xf32>
    %c0_58 = arith.constant 0 : index
    %c0_59 = arith.constant 0 : index
    %154 = vector.load %arg12[%c0_58, %c0_59] : memref<1x32xf32, #tpu.memory_space<vmem>>, vector<1x32xf32>
    %155 = vector.broadcast %154 : vector<1x32xf32> to vector<8x32xf32>
    %156 = arith.addf %153, %155 : vector<8x32xf32>
    %157 = arith.addf %142, %156 : vector<8x32xf32>
    %cst_60 = arith.constant dense<0.000000e+00> : vector<8xf32>
    %158 = vector.multi_reduction <add>, %157, %cst_60 [1] : vector<8x32xf32> to vector<8xf32>
    %159 = vector.shape_cast %158 : vector<8xf32> to vector<8x1xf32>
    %cst_61 = arith.constant 3.200000e+01 : f32
    %160 = vector.broadcast %cst_61 : f32 to vector<8x1xf32>
    %161 = arith.divf %159, %160 : vector<8x1xf32>
    %162 = vector.broadcast %161 : vector<8x1xf32> to vector<8x32xf32>
    %163 = arith.subf %157, %162 : vector<8x32xf32>
    %164 = arith.mulf %163, %163 : vector<8x32xf32>
    %cst_62 = arith.constant dense<0.000000e+00> : vector<8xf32>
    %165 = vector.multi_reduction <add>, %164, %cst_62 [1] : vector<8x32xf32> to vector<8xf32>
    %166 = vector.shape_cast %165 : vector<8xf32> to vector<8x1xf32>
    %cst_63 = arith.constant 3.200000e+01 : f32
    %167 = vector.broadcast %cst_63 : f32 to vector<8x1xf32>
    %168 = arith.divf %166, %167 : vector<8x1xf32>
    %169 = vector.broadcast %161 : vector<8x1xf32> to vector<8x32xf32>
    %170 = arith.subf %157, %169 : vector<8x32xf32>
    %cst_64 = arith.constant 9.99999974E-6 : f32
    %171 = vector.broadcast %cst_64 : f32 to vector<8x1xf32>
    %172 = arith.addf %168, %171 : vector<8x1xf32>
    %173 = math.rsqrt %172 : vector<8x1xf32>
    %174 = vector.broadcast %173 : vector<8x1xf32> to vector<8x32xf32>
    %175 = arith.mulf %170, %174 : vector<8x32xf32>
    %c0_65 = arith.constant 0 : index
    %c0_66 = arith.constant 0 : index
    %176 = vector.load %arg13[%c0_65, %c0_66] : memref<1x32xf32, #tpu.memory_space<vmem>>, vector<1x32xf32>
    %177 = vector.broadcast %176 : vector<1x32xf32> to vector<8x32xf32>
    %178 = arith.mulf %175, %177 : vector<8x32xf32>
    %c0_67 = arith.constant 0 : index
    %c0_68 = arith.constant 0 : index
    %179 = vector.load %arg14[%c0_67, %c0_68] : memref<1x32xf32, #tpu.memory_space<vmem>>, vector<1x32xf32>
    %180 = vector.broadcast %179 : vector<1x32xf32> to vector<8x32xf32>
    %181 = arith.addf %178, %180 : vector<8x32xf32>
    %c0_69 = arith.constant 0 : index
    %c0_70 = arith.constant 0 : index
    %c0_71 = arith.constant 0 : index
    %182 = vector.load %arg15[%c0_69, %c0_70, %c0_71] : memref<2x8x32xf32, #tpu.memory_space<vmem>>, vector<1x8x32xf32>
    %183 = vector.shape_cast %182 : vector<1x8x32xf32> to vector<8x32xf32>
    %184 = vector.shape_cast %181 : vector<8x32xf32> to vector<1x8x32xf32>
    tpu.vector_store %arg15[%c0_69, %c0_70, %c0_71], %184 {strides = array<i32>} : memref<2x8x32xf32, #tpu.memory_space<vmem>>, vector<1x8x32xf32>,
    %c1 = arith.constant 1 : index
    %c0_72 = arith.constant 0 : index
    %c0_73 = arith.constant 0 : index
    %185 = vector.load %arg1[%c1, %c0_72, %c0_73] : memref<2x8x32xf32, #tpu.memory_space<vmem>>, vector<1x8x32xf32>
    %186 = vector.shape_cast %185 : vector<1x8x32xf32> to vector<8x32xf32>
    %c1_74 = arith.constant 1 : index
    %c0_75 = arith.constant 0 : index
    %c0_76 = arith.constant 0 : index
    %187 = vector.load %arg2[%c1_74, %c0_75, %c0_76] : memref<2x8x8xf32, #tpu.memory_space<vmem>>, vector<1x8x8xf32>
    %188 = vector.shape_cast %187 : vector<1x8x8xf32> to vector<8x8xf32>
    %cst_77 = arith.constant 0.000000e+00 : f32
    %189 = vector.broadcast %cst_77 : f32 to vector<8x8xf32>
    %190 = arith.cmpf ogt, %188, %189 : vector<8x8xf32>
    %cst_78 = arith.constant 0.000000e+00 : f32
    %cst_79 = arith.constant -1.000000e+09 : f32
    %191 = vector.broadcast %cst_78 : f32 to vector<8x8xf32>
    %192 = vector.broadcast %cst_79 : f32 to vector<8x8xf32>
    %193 = arith.select %190, %191, %192 : vector<8x8xi1>, vector<8x8xf32>
    %194 = arith.truncf %186 : vector<8x32xf32> to vector<8x32xbf16>
    %c0_80 = arith.constant 0 : index
    %c0_81 = arith.constant 0 : index
    %195 = vector.load %arg3[%c0_80, %c0_81] : memref<32x96xbf16, #tpu.memory_space<vmem>>, vector<32x96xbf16>
    %cst_82 = arith.constant dense<0.000000e+00> : vector<8x96xf32>
    %196 = tpu.matmul %194, %195, %cst_82 {dimension_numbers = #tpu.dot_dimension_numbers<[1], [0], [0], [1], [0, 0, 1, 1], [], []>} : vector<8x32xbf16>, vector<32x96xbf16>, vector<8x96xf32> -> vector<8x96xf32>
    %c0_83 = arith.constant 0 : index
    %c0_84 = arith.constant 0 : index
    %197 = vector.load %arg4[%c0_83, %c0_84] : memref<1x96xf32, #tpu.memory_space<vmem>>, vector<1x96xf32>
    %198 = vector.broadcast %197 : vector<1x96xf32> to vector<8x96xf32>
    %199 = arith.addf %196, %198 : vector<8x96xf32>
    %200 = vector.extract_strided_slice %199 {offsets = [0, 0], sizes = [8, 32], strides = [1, 1]} : vector<8x96xf32> to vector<8x32xf32>
    %201 = vector.extract_strided_slice %199 {offsets = [0, 32], sizes = [8, 32], strides = [1, 1]} : vector<8x96xf32> to vector<8x32xf32>
    %202 = vector.extract_strided_slice %199 {offsets = [0, 64], sizes = [8, 32], strides = [1, 1]} : vector<8x96xf32> to vector<8x32xf32>
    %cst_85 = arith.constant 0.000000e+00 : f32
    %203 = vector.broadcast %cst_85 : f32 to vector<8x32xf32>
    %204 = vector.extract_strided_slice %200 {offsets = [0, 0], sizes = [8, 8], strides = [1, 1]} : vector<8x32xf32> to vector<8x8xf32>
    %205 = arith.truncf %204 : vector<8x8xf32> to vector<8x8xbf16>
    %206 = vector.extract_strided_slice %201 {offsets = [0, 0], sizes = [8, 8], strides = [1, 1]} : vector<8x32xf32> to vector<8x8xf32>
    %207 = arith.truncf %206 : vector<8x8xf32> to vector<8x8xbf16>
    %208 = vector.extract_strided_slice %202 {offsets = [0, 0], sizes = [8, 8], strides = [1, 1]} : vector<8x32xf32> to vector<8x8xf32>
    %209 = arith.truncf %208 : vector<8x8xf32> to vector<8x8xbf16>
    %cst_86 = arith.constant dense<0.000000e+00> : vector<8x8xf32>
    %210 = tpu.matmul %205, %207, %cst_86 {dimension_numbers = #tpu.dot_dimension_numbers<[1], [1], [0], [0], [0, 0, 1, 0], [], []>} : vector<8x8xbf16>, vector<8x8xbf16>, vector<8x8xf32> -> vector<8x8xf32>
    %211 = arith.addf %210, %193 : vector<8x8xf32>
    %cst_87 = arith.constant dense<0xFF800000> : vector<8xf32>
    %212 = vector.multi_reduction <maximumf>, %211, %cst_87 [1] : vector<8x8xf32> to vector<8xf32>
    %213 = vector.shape_cast %212 : vector<8xf32> to vector<8x1xf32>
    %214 = vector.broadcast %213 : vector<8x1xf32> to vector<8x8xf32>
    %215 = arith.subf %211, %214 : vector<8x8xf32>
    %216 = math.exp %215 : vector<8x8xf32>
    %cst_88 = arith.constant dense<0.000000e+00> : vector<8xf32>
    %217 = vector.multi_reduction <add>, %216, %cst_88 [1] : vector<8x8xf32> to vector<8xf32>
    %218 = vector.shape_cast %217 : vector<8xf32> to vector<8x1xf32>
    %219 = tpu.reciprocal %218 {approx = true} : vector<8x1xf32> -> vector<8x1xf32>
    %220 = vector.broadcast %219 : vector<8x1xf32> to vector<8x8xf32>
    %221 = arith.mulf %216, %220 : vector<8x8xf32>
    %222 = arith.truncf %221 : vector<8x8xf32> to vector<8x8xbf16>
    %cst_89 = arith.constant dense<0.000000e+00> : vector<8x8xf32>
    %223 = tpu.matmul %222, %209, %cst_89 {dimension_numbers = #tpu.dot_dimension_numbers<[1], [0], [0], [1], [0, 0, 1, 1], [], []>} : vector<8x8xbf16>, vector<8x8xbf16>, vector<8x8xf32> -> vector<8x8xf32>
    %224 = arith.truncf %223 : vector<8x8xf32> to vector<8x8xbf16>
    %c0_90 = arith.constant 0 : index
    %c0_91 = arith.constant 0 : index
    %225 = vector.load %arg5[%c0_90, %c0_91] : memref<32x32xbf16, #tpu.memory_space<vmem>>, vector<8x32xbf16>
    %cst_92 = arith.constant dense<0.000000e+00> : vector<8x32xf32>
    %226 = tpu.matmul %224, %225, %cst_92 {dimension_numbers = #tpu.dot_dimension_numbers<[1], [0], [0], [1], [0, 0, 1, 1], [], []>} : vector<8x8xbf16>, vector<8x32xbf16>, vector<8x32xf32> -> vector<8x32xf32>
    %227 = arith.addf %203, %226 : vector<8x32xf32>
    %228 = vector.extract_strided_slice %200 {offsets = [0, 8], sizes = [8, 8], strides = [1, 1]} : vector<8x32xf32> to vector<8x8xf32>
    %229 = arith.truncf %228 : vector<8x8xf32> to vector<8x8xbf16>
    %230 = vector.extract_strided_slice %201 {offsets = [0, 8], sizes = [8, 8], strides = [1, 1]} : vector<8x32xf32> to vector<8x8xf32>
    %231 = arith.truncf %230 : vector<8x8xf32> to vector<8x8xbf16>
    %232 = vector.extract_strided_slice %202 {offsets = [0, 8], sizes = [8, 8], strides = [1, 1]} : vector<8x32xf32> to vector<8x8xf32>
    %233 = arith.truncf %232 : vector<8x8xf32> to vector<8x8xbf16>
    %cst_93 = arith.constant dense<0.000000e+00> : vector<8x8xf32>
    %234 = tpu.matmul %229, %231, %cst_93 {dimension_numbers = #tpu.dot_dimension_numbers<[1], [1], [0], [0], [0, 0, 1, 0], [], []>} : vector<8x8xbf16>, vector<8x8xbf16>, vector<8x8xf32> -> vector<8x8xf32>
    %235 = arith.addf %234, %193 : vector<8x8xf32>
    %cst_94 = arith.constant dense<0xFF800000> : vector<8xf32>
    %236 = vector.multi_reduction <maximumf>, %235, %cst_94 [1] : vector<8x8xf32> to vector<8xf32>
    %237 = vector.shape_cast %236 : vector<8xf32> to vector<8x1xf32>
    %238 = vector.broadcast %237 : vector<8x1xf32> to vector<8x8xf32>
    %239 = arith.subf %235, %238 : vector<8x8xf32>
    %240 = math.exp %239 : vector<8x8xf32>
    %cst_95 = arith.constant dense<0.000000e+00> : vector<8xf32>
    %241 = vector.multi_reduction <add>, %240, %cst_95 [1] : vector<8x8xf32> to vector<8xf32>
    %242 = vector.shape_cast %241 : vector<8xf32> to vector<8x1xf32>
    %243 = tpu.reciprocal %242 {approx = true} : vector<8x1xf32> -> vector<8x1xf32>
    %244 = vector.broadcast %243 : vector<8x1xf32> to vector<8x8xf32>
    %245 = arith.mulf %240, %244 : vector<8x8xf32>
    %246 = arith.truncf %245 : vector<8x8xf32> to vector<8x8xbf16>
    %cst_96 = arith.constant dense<0.000000e+00> : vector<8x8xf32>
    %247 = tpu.matmul %246, %233, %cst_96 {dimension_numbers = #tpu.dot_dimension_numbers<[1], [0], [0], [1], [0, 0, 1, 1], [], []>} : vector<8x8xbf16>, vector<8x8xbf16>, vector<8x8xf32> -> vector<8x8xf32>
    %248 = arith.truncf %247 : vector<8x8xf32> to vector<8x8xbf16>
    %c8_97 = arith.constant 8 : index
    %c0_98 = arith.constant 0 : index
    %249 = vector.load %arg5[%c8_97, %c0_98] : memref<32x32xbf16, #tpu.memory_space<vmem>>, vector<8x32xbf16>
    %cst_99 = arith.constant dense<0.000000e+00> : vector<8x32xf32>
    %250 = tpu.matmul %248, %249, %cst_99 {dimension_numbers = #tpu.dot_dimension_numbers<[1], [0], [0], [1], [0, 0, 1, 1], [], []>} : vector<8x8xbf16>, vector<8x32xbf16>, vector<8x32xf32> -> vector<8x32xf32>
    %251 = arith.addf %227, %250 : vector<8x32xf32>
    %252 = vector.extract_strided_slice %200 {offsets = [0, 16], sizes = [8, 8], strides = [1, 1]} : vector<8x32xf32> to vector<8x8xf32>
    %253 = arith.truncf %252 : vector<8x8xf32> to vector<8x8xbf16>
    %254 = vector.extract_strided_slice %201 {offsets = [0, 16], sizes = [8, 8], strides = [1, 1]} : vector<8x32xf32> to vector<8x8xf32>
    %255 = arith.truncf %254 : vector<8x8xf32> to vector<8x8xbf16>
    %256 = vector.extract_strided_slice %202 {offsets = [0, 16], sizes = [8, 8], strides = [1, 1]} : vector<8x32xf32> to vector<8x8xf32>
    %257 = arith.truncf %256 : vector<8x8xf32> to vector<8x8xbf16>
    %cst_100 = arith.constant dense<0.000000e+00> : vector<8x8xf32>
    %258 = tpu.matmul %253, %255, %cst_100 {dimension_numbers = #tpu.dot_dimension_numbers<[1], [1], [0], [0], [0, 0, 1, 0], [], []>} : vector<8x8xbf16>, vector<8x8xbf16>, vector<8x8xf32> -> vector<8x8xf32>
    %259 = arith.addf %258, %193 : vector<8x8xf32>
    %cst_101 = arith.constant dense<0xFF800000> : vector<8xf32>
    %260 = vector.multi_reduction <maximumf>, %259, %cst_101 [1] : vector<8x8xf32> to vector<8xf32>
    %261 = vector.shape_cast %260 : vector<8xf32> to vector<8x1xf32>
    %262 = vector.broadcast %261 : vector<8x1xf32> to vector<8x8xf32>
    %263 = arith.subf %259, %262 : vector<8x8xf32>
    %264 = math.exp %263 : vector<8x8xf32>
    %cst_102 = arith.constant dense<0.000000e+00> : vector<8xf32>
    %265 = vector.multi_reduction <add>, %264, %cst_102 [1] : vector<8x8xf32> to vector<8xf32>
    %266 = vector.shape_cast %265 : vector<8xf32> to vector<8x1xf32>
    %267 = tpu.reciprocal %266 {approx = true} : vector<8x1xf32> -> vector<8x1xf32>
    %268 = vector.broadcast %267 : vector<8x1xf32> to vector<8x8xf32>
    %269 = arith.mulf %264, %268 : vector<8x8xf32>
    %270 = arith.truncf %269 : vector<8x8xf32> to vector<8x8xbf16>
    %cst_103 = arith.constant dense<0.000000e+00> : vector<8x8xf32>
    %271 = tpu.matmul %270, %257, %cst_103 {dimension_numbers = #tpu.dot_dimension_numbers<[1], [0], [0], [1], [0, 0, 1, 1], [], []>} : vector<8x8xbf16>, vector<8x8xbf16>, vector<8x8xf32> -> vector<8x8xf32>
    %272 = arith.truncf %271 : vector<8x8xf32> to vector<8x8xbf16>
    %c16_104 = arith.constant 16 : index
    %c0_105 = arith.constant 0 : index
    %273 = vector.load %arg5[%c16_104, %c0_105] : memref<32x32xbf16, #tpu.memory_space<vmem>>, vector<8x32xbf16>
    %cst_106 = arith.constant dense<0.000000e+00> : vector<8x32xf32>
    %274 = tpu.matmul %272, %273, %cst_106 {dimension_numbers = #tpu.dot_dimension_numbers<[1], [0], [0], [1], [0, 0, 1, 1], [], []>} : vector<8x8xbf16>, vector<8x32xbf16>, vector<8x32xf32> -> vector<8x32xf32>
    %275 = arith.addf %251, %274 : vector<8x32xf32>
    %276 = vector.extract_strided_slice %200 {offsets = [0, 24], sizes = [8, 8], strides = [1, 1]} : vector<8x32xf32> to vector<8x8xf32>
    %277 = arith.truncf %276 : vector<8x8xf32> to vector<8x8xbf16>
    %278 = vector.extract_strided_slice %201 {offsets = [0, 24], sizes = [8, 8], strides = [1, 1]} : vector<8x32xf32> to vector<8x8xf32>
    %279 = arith.truncf %278 : vector<8x8xf32> to vector<8x8xbf16>
    %280 = vector.extract_strided_slice %202 {offsets = [0, 24], sizes = [8, 8], strides = [1, 1]} : vector<8x32xf32> to vector<8x8xf32>
    %281 = arith.truncf %280 : vector<8x8xf32> to vector<8x8xbf16>
    %cst_107 = arith.constant dense<0.000000e+00> : vector<8x8xf32>
    %282 = tpu.matmul %277, %279, %cst_107 {dimension_numbers = #tpu.dot_dimension_numbers<[1], [1], [0], [0], [0, 0, 1, 0], [], []>} : vector<8x8xbf16>, vector<8x8xbf16>, vector<8x8xf32> -> vector<8x8xf32>
    %283 = arith.addf %282, %193 : vector<8x8xf32>
    %cst_108 = arith.constant dense<0xFF800000> : vector<8xf32>
    %284 = vector.multi_reduction <maximumf>, %283, %cst_108 [1] : vector<8x8xf32> to vector<8xf32>
    %285 = vector.shape_cast %284 : vector<8xf32> to vector<8x1xf32>
    %286 = vector.broadcast %285 : vector<8x1xf32> to vector<8x8xf32>
    %287 = arith.subf %283, %286 : vector<8x8xf32>
    %288 = math.exp %287 : vector<8x8xf32>
    %cst_109 = arith.constant dense<0.000000e+00> : vector<8xf32>
    %289 = vector.multi_reduction <add>, %288, %cst_109 [1] : vector<8x8xf32> to vector<8xf32>
    %290 = vector.shape_cast %289 : vector<8xf32> to vector<8x1xf32>
    %291 = tpu.reciprocal %290 {approx = true} : vector<8x1xf32> -> vector<8x1xf32>
    %292 = vector.broadcast %291 : vector<8x1xf32> to vector<8x8xf32>
    %293 = arith.mulf %288, %292 : vector<8x8xf32>
    %294 = arith.truncf %293 : vector<8x8xf32> to vector<8x8xbf16>
    %cst_110 = arith.constant dense<0.000000e+00> : vector<8x8xf32>
    %295 = tpu.matmul %294, %281, %cst_110 {dimension_numbers = #tpu.dot_dimension_numbers<[1], [0], [0], [1], [0, 0, 1, 1], [], []>} : vector<8x8xbf16>, vector<8x8xbf16>, vector<8x8xf32> -> vector<8x8xf32>
    %296 = arith.truncf %295 : vector<8x8xf32> to vector<8x8xbf16>
    %c24_111 = arith.constant 24 : index
    %c0_112 = arith.constant 0 : index
    %297 = vector.load %arg5[%c24_111, %c0_112] : memref<32x32xbf16, #tpu.memory_space<vmem>>, vector<8x32xbf16>
    %cst_113 = arith.constant dense<0.000000e+00> : vector<8x32xf32>
    %298 = tpu.matmul %296, %297, %cst_113 {dimension_numbers = #tpu.dot_dimension_numbers<[1], [0], [0], [1], [0, 0, 1, 1], [], []>} : vector<8x8xbf16>, vector<8x32xbf16>, vector<8x32xf32> -> vector<8x32xf32>
    %299 = arith.addf %275, %298 : vector<8x32xf32>
    %c0_114 = arith.constant 0 : index
    %c0_115 = arith.constant 0 : index
    %300 = vector.load %arg6[%c0_114, %c0_115] : memref<1x32xf32, #tpu.memory_space<vmem>>, vector<1x32xf32>
    %301 = vector.broadcast %300 : vector<1x32xf32> to vector<8x32xf32>
    %302 = arith.addf %299, %301 : vector<8x32xf32>
    %303 = arith.addf %186, %302 : vector<8x32xf32>
    %cst_116 = arith.constant dense<0.000000e+00> : vector<8xf32>
    %304 = vector.multi_reduction <add>, %303, %cst_116 [1] : vector<8x32xf32> to vector<8xf32>
    %305 = vector.shape_cast %304 : vector<8xf32> to vector<8x1xf32>
    %cst_117 = arith.constant 3.200000e+01 : f32
    %306 = vector.broadcast %cst_117 : f32 to vector<8x1xf32>
    %307 = arith.divf %305, %306 : vector<8x1xf32>
    %308 = vector.broadcast %307 : vector<8x1xf32> to vector<8x32xf32>
    %309 = arith.subf %303, %308 : vector<8x32xf32>
    %310 = arith.mulf %309, %309 : vector<8x32xf32>
    %cst_118 = arith.constant dense<0.000000e+00> : vector<8xf32>
    %311 = vector.multi_reduction <add>, %310, %cst_118 [1] : vector<8x32xf32> to vector<8xf32>
    %312 = vector.shape_cast %311 : vector<8xf32> to vector<8x1xf32>
    %cst_119 = arith.constant 3.200000e+01 : f32
    %313 = vector.broadcast %cst_119 : f32 to vector<8x1xf32>
    %314 = arith.divf %312, %313 : vector<8x1xf32>
    %315 = vector.broadcast %307 : vector<8x1xf32> to vector<8x32xf32>
    %316 = arith.subf %303, %315 : vector<8x32xf32>
    %cst_120 = arith.constant 9.99999974E-6 : f32
    %317 = vector.broadcast %cst_120 : f32 to vector<8x1xf32>
    %318 = arith.addf %314, %317 : vector<8x1xf32>
    %319 = math.rsqrt %318 : vector<8x1xf32>
    %320 = vector.broadcast %319 : vector<8x1xf32> to vector<8x32xf32>
    %321 = arith.mulf %316, %320 : vector<8x32xf32>
    %c0_121 = arith.constant 0 : index
    %c0_122 = arith.constant 0 : index
    %322 = vector.load %arg7[%c0_121, %c0_122] : memref<1x32xf32, #tpu.memory_space<vmem>>, vector<1x32xf32>
    %323 = vector.broadcast %322 : vector<1x32xf32> to vector<8x32xf32>
    %324 = arith.mulf %321, %323 : vector<8x32xf32>
    %c0_123 = arith.constant 0 : index
    %c0_124 = arith.constant 0 : index
    %325 = vector.load %arg8[%c0_123, %c0_124] : memref<1x32xf32, #tpu.memory_space<vmem>>, vector<1x32xf32>
    %326 = vector.broadcast %325 : vector<1x32xf32> to vector<8x32xf32>
    %327 = arith.addf %324, %326 : vector<8x32xf32>
    %328 = arith.truncf %327 : vector<8x32xf32> to vector<8x32xbf16>
    %c0_125 = arith.constant 0 : index
    %c0_126 = arith.constant 0 : index
    %329 = vector.load %arg9[%c0_125, %c0_126] : memref<32x64xbf16, #tpu.memory_space<vmem>>, vector<32x64xbf16>
    %cst_127 = arith.constant dense<0.000000e+00> : vector<8x64xf32>
    %330 = tpu.matmul %328, %329, %cst_127 {dimension_numbers = #tpu.dot_dimension_numbers<[1], [0], [0], [1], [0, 0, 1, 1], [], []>} : vector<8x32xbf16>, vector<32x64xbf16>, vector<8x64xf32> -> vector<8x64xf32>
    %c0_128 = arith.constant 0 : index
    %c0_129 = arith.constant 0 : index
    %331 = vector.load %arg10[%c0_128, %c0_129] : memref<1x64xf32, #tpu.memory_space<vmem>>, vector<1x64xf32>
    %332 = vector.broadcast %331 : vector<1x64xf32> to vector<8x64xf32>
    %333 = arith.addf %330, %332 : vector<8x64xf32>
    %cst_130 = arith.constant 0.000000e+00 : f32
    %334 = vector.broadcast %cst_130 : f32 to vector<8x64xf32>
    %335 = arith.maximumf %333, %334 : vector<8x64xf32>
    %336 = arith.truncf %335 : vector<8x64xf32> to vector<8x64xbf16>
    %c0_131 = arith.constant 0 : index
    %c0_132 = arith.constant 0 : index
    %337 = vector.load %arg11[%c0_131, %c0_132] : memref<64x32xbf16, #tpu.memory_space<vmem>>, vector<64x32xbf16>
    %cst_133 = arith.constant dense<0.000000e+00> : vector<8x32xf32>
    %338 = tpu.matmul %336, %337, %cst_133 {dimension_numbers = #tpu.dot_dimension_numbers<[1], [0], [0], [1], [0, 0, 1, 1], [], []>} : vector<8x64xbf16>, vector<64x32xbf16>, vector<8x32xf32> -> vector<8x32xf32>
    %c0_134 = arith.constant 0 : index
    %c0_135 = arith.constant 0 : index
    %339 = vector.load %arg12[%c0_134, %c0_135] : memref<1x32xf32, #tpu.memory_space<vmem>>, vector<1x32xf32>
    %340 = vector.broadcast %339 : vector<1x32xf32> to vector<8x32xf32>
    %341 = arith.addf %338, %340 : vector<8x32xf32>
    %342 = arith.addf %327, %341 : vector<8x32xf32>
    %cst_136 = arith.constant dense<0.000000e+00> : vector<8xf32>
    %343 = vector.multi_reduction <add>, %342, %cst_136 [1] : vector<8x32xf32> to vector<8xf32>
    %344 = vector.shape_cast %343 : vector<8xf32> to vector<8x1xf32>
    %cst_137 = arith.constant 3.200000e+01 : f32
    %345 = vector.broadcast %cst_137 : f32 to vector<8x1xf32>
    %346 = arith.divf %344, %345 : vector<8x1xf32>
    %347 = vector.broadcast %346 : vector<8x1xf32> to vector<8x32xf32>
    %348 = arith.subf %342, %347 : vector<8x32xf32>
    %349 = arith.mulf %348, %348 : vector<8x32xf32>
    %cst_138 = arith.constant dense<0.000000e+00> : vector<8xf32>
    %350 = vector.multi_reduction <add>, %349, %cst_138 [1] : vector<8x32xf32> to vector<8xf32>
    %351 = vector.shape_cast %350 : vector<8xf32> to vector<8x1xf32>
    %cst_139 = arith.constant 3.200000e+01 : f32
    %352 = vector.broadcast %cst_139 : f32 to vector<8x1xf32>
    %353 = arith.divf %351, %352 : vector<8x1xf32>
    %354 = vector.broadcast %346 : vector<8x1xf32> to vector<8x32xf32>
    %355 = arith.subf %342, %354 : vector<8x32xf32>
    %cst_140 = arith.constant 9.99999974E-6 : f32
    %356 = vector.broadcast %cst_140 : f32 to vector<8x1xf32>
    %357 = arith.addf %353, %356 : vector<8x1xf32>
    %358 = math.rsqrt %357 : vector<8x1xf32>
    %359 = vector.broadcast %358 : vector<8x1xf32> to vector<8x32xf32>
    %360 = arith.mulf %355, %359 : vector<8x32xf32>
    %c0_141 = arith.constant 0 : index
    %c0_142 = arith.constant 0 : index
    %361 = vector.load %arg13[%c0_141, %c0_142] : memref<1x32xf32, #tpu.memory_space<vmem>>, vector<1x32xf32>
    %362 = vector.broadcast %361 : vector<1x32xf32> to vector<8x32xf32>
    %363 = arith.mulf %360, %362 : vector<8x32xf32>
    %c0_143 = arith.constant 0 : index
    %c0_144 = arith.constant 0 : index
    %364 = vector.load %arg14[%c0_143, %c0_144] : memref<1x32xf32, #tpu.memory_space<vmem>>, vector<1x32xf32>
    %365 = vector.broadcast %364 : vector<1x32xf32> to vector<8x32xf32>
    %366 = arith.addf %363, %365 : vector<8x32xf32>
    %c1_145 = arith.constant 1 : index
    %c0_146 = arith.constant 0 : index
    %c0_147 = arith.constant 0 : index
    %367 = vector.load %arg15[%c1_145, %c0_146, %c0_147] : memref<2x8x32xf32, #tpu.memory_space<vmem>>, vector<1x8x32xf32>
    %368 = vector.shape_cast %367 : vector<1x8x32xf32> to vector<8x32xf32>
    %369 = vector.shape_cast %366 : vector<8x32xf32> to vector<1x8x32xf32>
    tpu.vector_store %arg15[%c1_145, %c0_146, %c0_147], %369 {strides = array<i32>} : memref<2x8x32xf32, #tpu.memory_space<vmem>>, vector<1x8x32xf32>,
    return
  }
  func.func @transform_0(%arg0: i32) -> (i32, i32, i32) {
    %c0_i32 = arith.constant 0 : i32
    %c0_i32_0 = arith.constant 0 : i32
    %c0_i32_1 = arith.constant 0 : i32
    return %arg0, %c0_i32, %c0_i32_0 : i32, i32, i32
  }
  func.func @transform_1(%arg0: i32) -> (i32, i32, i32) {
    %c0_i32 = arith.constant 0 : i32
    %c0_i32_0 = arith.constant 0 : i32
    %c0_i32_1 = arith.constant 0 : i32
    return %arg0, %c0_i32, %c0_i32_0 : i32, i32, i32
  }
  func.func @transform_2(%arg0: i32) -> (i32, i32) {
    %c0_i32 = arith.constant 0 : i32
    %c0_i32_0 = arith.constant 0 : i32
    %c0_i32_1 = arith.constant 0 : i32
    return %c0_i32, %c0_i32_0 : i32, i32
  }
  func.func @transform_3(%arg0: i32) -> (i32, i32) {
    %c0_i32 = arith.constant 0 : i32
    %c0_i32_0 = arith.constant 0 : i32
    %c0_i32_1 = arith.constant 0 : i32
    return %c0_i32, %c0_i32_0 : i32, i32
  }
  func.func @transform_4(%arg0: i32) -> (i32, i32) {
    %c0_i32 = arith.constant 0 : i32
    %c0_i32_0 = arith.constant 0 : i32
    %c0_i32_1 = arith.constant 0 : i32
    return %c0_i32, %c0_i32_0 : i32, i32
  }
  func.func @transform_5(%arg0: i32) -> (i32, i32) {
    %c0_i32 = arith.constant 0 : i32
    %c0_i32_0 = arith.constant 0 : i32
    %c0_i32_1 = arith.constant 0 : i32
    return %c0_i32, %c0_i32_0 : i32, i32
  }
  func.func @transform_6(%arg0: i32) -> (i32, i32) {
    %c0_i32 = arith.constant 0 : i32
    %c0_i32_0 = arith.constant 0 : i32
    %c0_i32_1 = arith.constant 0 : i32
    return %c0_i32, %c0_i32_0 : i32, i32
  }
  func.func @transform_7(%arg0: i32) -> (i32, i32) {
    %c0_i32 = arith.constant 0 : i32
    %c0_i32_0 = arith.constant 0 : i32
    %c0_i32_1 = arith.constant 0 : i32
    return %c0_i32, %c0_i32_0 : i32, i32
  }
  func.func @transform_8(%arg0: i32) -> (i32, i32) {
    %c0_i32 = arith.constant 0 : i32
    %c0_i32_0 = arith.constant 0 : i32
    %c0_i32_1 = arith.constant 0 : i32
    return %c0_i32, %c0_i32_0 : i32, i32
  }
  func.func @transform_9(%arg0: i32) -> (i32, i32) {
    %c0_i32 = arith.constant 0 : i32
    %c0_i32_0 = arith.constant 0 : i32
    %c0_i32_1 = arith.constant 0 : i32
    return %c0_i32, %c0_i32_0 : i32, i32
  }
  func.func @transform_10(%arg0: i32) -> (i32, i32) {
    %c0_i32 = arith.constant 0 : i32
    %c0_i32_0 = arith.constant 0 : i32
    %c0_i32_1 = arith.constant 0 : i32
    return %c0_i32, %c0_i32_0 : i32, i32
  }
  func.func @transform_11(%arg0: i32) -> (i32, i32) {
    %c0_i32 = arith.constant 0 : i32
    %c0_i32_0 = arith.constant 0 : i32
    %c0_i32_1 = arith.constant 0 : i32
    return %c0_i32, %c0_i32_0 : i32, i32
  }
  func.func @transform_12(%arg0: i32) -> (i32, i32) {
    %c0_i32 = arith.constant 0 : i32
    %c0_i32_0 = arith.constant 0 : i32
    %c0_i32_1 = arith.constant 0 : i32
    return %c0_i32, %c0_i32_0 : i32, i32
  }
  func.func @transform_13(%arg0: i32) -> (i32, i32) {
    %c0_i32 = arith.constant 0 : i32
    %c0_i32_0 = arith.constant 0 : i32
    %c0_i32_1 = arith.constant 0 : i32
    return %c0_i32, %c0_i32_0 : i32, i32
  }
  func.func @transform_14(%arg0: i32) -> (i32, i32, i32) {
    %c0_i32 = arith.constant 0 : i32
    %c0_i32_0 = arith.constant 0 : i32
    %c0_i32_1 = arith.constant 0 : i32
    return %arg0, %c0_i32, %c0_i32_0 : i32, i32, i32
  }
}

</mosaic_0001>

<bundles_post_ra>
// kernel: tpu_custom_call.1
= control target key start
LH: loop header
LB: loop body
LE: loop exit
PB: predicated region body
PF: predicated region fallthrough
CT: control target
= control target key end

     0   :  { %19 = vsyncpa [#allocation3], 0  ;;  %s1788_s0 = inlined_call_operand.vmem [shape: f32[2,8,32], index: 0, kind: input, shape index: {}]   ;;  %s1789_s1 = inlined_call_operand.vmem [shape: f32[2,8,8], index: 1, kind: input, shape index: {}]   ;;  %s1790_s2 = inlined_call_operand.vmem [shape: bf16[32,96], index: 2, kind: input, shape index: {}]   ;;  %s1791_s3 = inlined_call_operand.vmem [shape: f32[1,96], index: 3, kind: input, shape index: {}]   ;;  %s1792_s4 = inlined_call_operand.hbm [shape: bf16[32,32], index: 4, kind: input, shape index: {}]   ;;  %s1793_s5 = inlined_call_operand.vmem [shape: f32[1,32], index: 5, kind: input, shape index: {}]   ;;  %s1794_s6 = inlined_call_operand.vmem [shape: f32[1,32], index: 6, kind: input, shape index: {}]   ;;  %s1795_s7 = inlined_call_operand.vmem [shape: f32[1,32], index: 7, kind: input, shape index: {}]   ;;  %s1796_s8 = inlined_call_operand.hbm [shape: bf16[32,64], index: 8, kind: input, shape index: {}]   ;;  %s1797_s9 = inlined_call_operand.vmem [shape: f32[1,64], index: 9, kind: input, shape index: {}]   ;;  %s1798_s10 = inlined_call_operand.vmem [shape: bf16[64,32], index: 10, kind: input, shape index: {}]   ;;  %s1799_s11 = inlined_call_operand.vmem [shape: f32[1,32], index: 11, kind: input, shape index: {}]   ;;  %s1800_s12 = inlined_call_operand.vmem [shape: f32[1,32], index: 12, kind: input, shape index: {}]   ;;  %s1801_s13 = inlined_call_operand.vmem [shape: f32[1,32], index: 13, kind: input, shape index: {}]   ;;  %s1802_s14 = inlined_call_operand.hbm [shape: f32[2,8,32], index: 14, kind: output, shape index: {}]  }
   0x1   :  { %20 = vsyncpa [#allocation6], 0 }
   0x2   :  { %21 = vsyncpa [#allocation4], 0  ;;  %s34_s15 = sshll.u32 %s1792_s4, 4  ;;  %s1410_s16 = smov [#allocation2]   ;;  %s35_s15 = int_to_ptr.hbm [resolvable:$true] %s34_s15 }
   0x3   :  { %s36_s17 = sshll.u32 %s1410_s16, 4  ;;  %s53_s20 = sshll.u32 %s1796_s8, 4  ;;  %s37_s17 = int_to_ptr.vmem [resolvable:$true] %s36_s17  ;;  %s54_s20 = int_to_ptr.hbm [resolvable:$true] %s53_s20 }
   0x4   :  { %s1411_s21 = smov 64   ;;  %s1412_s22 = smov 4  }
   0x5   :  { %42 = dma.hbm_to_vmem [thread:$0]  %s35_s15, 256, %s37_s17, [#allocation3], %s1411_s21, %s1411_s21, %s1412_s22  }
   0x6   :  { %s1413_s23 = smov [#allocation5]  }
   0x7   :  { %s55_s24 = sshll.u32 %s1413_s23, 4  ;;  %s56_s24 = int_to_ptr.vmem [resolvable:$true] %s55_s24 }
   0x8   :  { %61 = dma.hbm_to_vmem [thread:$0]  %s54_s20, 256, %s56_s24, [#allocation6], %s1411_s21, %s1411_s21, %s1412_s22  }
   0x9   :  { %1404 = dma.done.wait [#allocation3], 256  }
   0xa   :  { %1405 = vsyncadd [#allocation3], 4294967040 }
   0xb   :  { %1406 = dma.done.wait [#allocation6], 256  }
   0xc   :  { %1407 = vsyncadd [#allocation6], 4294967040  ;;  %v1240_v0 = vld [vmem:[%s1790_s2 + $0x8] sm:$0xff]  ;;  %v1239_v1 = vld [vmem:[%s1790_s2] sm:$0xff]  ;;  %vm106_vm0 = vcmask 261120   ;;  %s1414_s15 = smov 72  }
   0xd   :  { %v1523_v2 = vld [vmem:[%s1788_s0] sm:$0xff]  ;;  %116 = vmatpush.bf16.msra.mxu0 %v1240_v0  ;;  %s1415_s16 = smov 96   ;;  %s1416_s17 = smov 88   ;;  %vm127_vm1 = vcmask 64512   ;;  %vm164_vm2 = vcmask 1043456   ;;  %vm555_vm9 = vcmask 523264  }
   0xe   :  { %v85_v3 = vpack.c.bf16 %v1523_v2, %v1523_v2  ;;  %v1274_v4 = vld [vmem:[%s1791_s3] ss:$0 sm:$0xff]  ;;  %s1417_s18 = smov 104   ;;  %s1418_s19 = smov 120   ;;  %v1420_v23 = vmov -1e+09  }
   0xf   :  { %s1419_s20 = smov 80   ;;  %v182_v13 = vld [vmem:[#allocation2] sm:$0xf]  ;;  %s1421_s24 = smov 112  }
  0x10   :  { %v264_v16 = vsel %vm164_vm2, %v182_v13, 0  ;;  %v82_v21 = vld [vmem:[%s1789_s1] sm:$0xff]  ;;  %s1422_s4 = smov 48   ;;  %s1423_s25 = smov 56  }
  0x11   :  { %117 = vmatpush.bf16.msra.mxu0 %v1239_v1  ;;  %vm83_vm3 = vcmp.gt.f32.partialorder %v82_v21, 0.0  ;;  %s1424_s8 = smov 40   ;;  %s1428_s23 = smov 8  }
  0x12   :  { %v84_v24 = vsel %vm83_vm3, 0.0, %v1420_v23 }
  0x14   :  { %1151 = vmatmul.msk.bf16.vlgmr.msra.gmra.mxu0 %vm106_vm0, %v85_v3 }
  0x91   :  { %v119_v5 = vpop.f32.mrf.mxu0 }
  0x92   :  { %v120_v6 = vadd.f32 %v1274_v4, %v119_v5 }
  0x94   :  { %v1531_v7 = vpack.c.bf16 %v120_v6, %v120_v6 }
  0x96   :  { %359 = vrot.lane.b32.xlu2 %v1531_v7, %s1414_s15  ;;  %125 = vrot.lane.b32.xlu0 %v1531_v7, %s1415_s16 }
  0x99   :  { %v121_v8 = vpop.f32.mrf.mxu0 }
  0x9e   :  { %185 = vrot.lane.b32.xlu2 %v1531_v7, %s1416_s17 }
  0xa6   :  { %357 = vrot.lane.b32.xlu2 %v1531_v7, %s1417_s18 }
  0xae   :  { %183 = vrot.lane.b32.xlu2 %v1531_v7, %s1418_s19 }
  0xb6   :  { %281 = vrot.lane.b32.xlu2 %v1531_v7, %s1419_s20 }
  0xf0   :  { %v360_v9 = vpop.permute.xlu2 %359 }
  0xf1   :  { %v365_v19 = vsel %vm127_vm1, %v360_v9, 0 }
  0xf8   :  { %v186_v10 = vpop.permute.xlu2 %185 }
  0xf9   :  { %v191_v11 = vsel %vm127_vm1, %v186_v10, 0 }
  0xfa   :  { %200 = vmatpush.bf16.xpose.msra.mxu3 %v191_v11 }
 0x100   :  { %v1546_v12 = vpop.permute.xlu2 %357 }
 0x108   :  { %v184_v14 = vpop.permute.xlu2 %183  ;;  %v126_v15 = vpop.permute.xlu0 %125 }
 0x109   :  { %1154 = vmatmul.msk.bf16.vlgmr.msra.gmra.mxu3 %vm127_vm1, %v184_v14  ;;  %v132_v17 = vsel %vm127_vm1, %v126_v15, 0 }
 0x10a   :  { %141 = vmatpush.bf16.xpose.msra.mxu1 %v132_v17 }
 0x110   :  { %v282_v18 = vpop.permute.xlu2 %281 }
 0x111   :  { %1152 = vmatmul.msk.bf16.vlgmr.msra.gmra.mxu1 %vm127_vm1, %v1531_v7  ;;  %v287_v20 = vsel %vm127_vm1, %v282_v18, 0 }
 0x112   :  { %273 = vmatpush.bf16.msrb.mxu1 %v264_v16  ;;  %296 = vmatpush.bf16.xpose.msrb.mxu3 %v287_v20 }
 0x116   :  { %374 = vmatpush.bf16.xpose.msra.mxu1 %v365_v19 }
 0x18c   :  { %v202_v22 = vpop.f32.mrf.mxu3 }
 0x18d   :  { %v203_v35 = vadd.f32 %v202_v22, %v84_v24  ;;  %v240_v22 = vld [vmem:[#allocation2 + $0x4] sm:$0xf] }
 0x18e   :  { %v143_v25 = vpop.f32.mrf.mxu1 }
 0x18f   :  { %v144_v26 = vadd.f32 %v143_v25, %v84_v24  ;;  %v206_v36 = vsel %vm127_vm1, %v203_v35, -inf  ;;  %v336_v25 = vld [vmem:[#allocation2 + $0x8] sm:$0xf] }
 0x191   :  { %v147_v27 = vsel %vm127_vm1, %v144_v26, -inf }
 0x192   :  { %148 = vmax.xlane.f32.xlu0 %v147_v27 }
 0x194   :  { %v204_v28 = vpop.f32.mrf.mxu3 }
 0x196   :  { %v145_v29 = vpop.f32.mrf.mxu1 }
 0x205   :  { %v149_v30 = vpop.xlane.xlu0 %148 }
 0x206   :  { %v150_v31 = vsub.f32 %v144_v26, %v149_v30  ;;  %v341_v26 = vsel %vm164_vm2, %v336_v25, 0 }
 0x208   :  { %v151_v32 = vmul.f32 1.442695, %v150_v31 }
 0x20a   :  { %1290 = vpow2.f32 %v151_v32  ;;  %v1248_v32 = vld [vmem:[%s1790_s2 + $0x8] sm:$0xff] }
 0x210   :  { %v1291_v33 = vpop.eup %1290 }
 0x211   :  { %v153_v34 = vsel %vm127_vm1, %v1291_v33, 0.0 }
 0x212   :  { %154 = vadd.xlane.f32.xlu1 %v153_v34 }
 0x22b   :  { %159 = vrot.lane.b32.xlu1 %v1531_v7, %s1411_s21 }
 0x233   :  { %279 = vrot.lane.b32.xlu1 %v1531_v7, %s1421_s24 }
 0x25d   :  { %207 = vmax.xlane.f32.xlu1 %v206_v36 }
 0x285   :  { %v155_v37 = vpop.xlane.xlu1 %154 }
 0x286   :  { %1292 = vrcp.f32 %v155_v37 }
 0x28c   :  { %v1293_v38 = vpop.eup %1292 }
 0x28d   :  { %v157_v39 = vmul.f32 %v1293_v38, %v1291_v33 }
 0x28f   :  { %v158_v42 = vpack.c.bf16 %v157_v39, %v157_v39  ;;  %v1603_v39 = vld [vmem:[%s1788_s0 + $0x8] sm:$0xff] }
 0x29d   :  { %v160_v40 = vpop.permute.xlu1 %159 }
 0x29e   :  { %v166_v41 = vsel %vm164_vm2, %v160_v40, 0  ;;  %v612_v40 = vpack.c.bf16 %v1603_v39, %v1603_v39 }
 0x29f   :  { %175 = vmatpush.bf16.msra.mxu2 %v166_v41 }
 0x2a2   :  { %1153 = vmatmul.msk.bf16.vlgmr.msra.gmra.mxu2 %vm127_vm1, %v158_v42  ;;  %v414_v42 = vld [vmem:[#allocation2 + $0xc] sm:$0xf] }
 0x2a5   :  { %v280_v43 = vpop.permute.xlu1 %279 }
 0x2a6   :  { %1158 = vmatmul.msk.bf16.vlgmr.msrb.gmra.mxu3 %vm127_vm1, %v280_v43  ;;  %v419_v43 = vsel %vm164_vm2, %v414_v42, 0 }
 0x2d0   :  { %v208_v44 = vpop.xlane.xlu1 %207 }
 0x2d1   :  { %v209_v45 = vsub.f32 %v203_v35, %v208_v44  ;;  %v1247_v35 = vld [vmem:[%s1790_s2] sm:$0xff] }
 0x2d3   :  { %v210_v48 = vmul.f32 1.442695, %v209_v45 }
 0x2d5   :  { %1294 = vpow2.f32 %v210_v48 }
 0x2db   :  { %v1295_v53 = vpop.eup %1294 }
 0x2dc   :  { %v212_v55 = vsel %vm127_vm1, %v1295_v53, 0.0 }
 0x325   :  { %v177_v46 = vpop.f32.mrf.mxu2 }
 0x326   :  { %v181_v47 = vpack.c.bf16 %v177_v46, %v177_v46 }
 0x328   :  { %1157 = vmatmul.msk.bf16.vlgmr.msrb.gmra.mxu1 %vm127_vm1, %v181_v47 }
 0x329   :  { %v298_v49 = vpop.f32.mrf.mxu3 }
 0x32a   :  { %v299_v50 = vadd.f32 %v298_v49, %v84_v24 }
 0x32c   :  { %v302_v51 = vsel %vm127_vm1, %v299_v50, -inf }
 0x32d   :  { %v179_v52 = vpop.f32.mrf.mxu2  ;;  %303 = vmax.xlane.f32.xlu0 %v302_v51 }
 0x331   :  { %v300_v54 = vpop.f32.mrf.mxu3 }
 0x335   :  { %213 = vadd.xlane.f32.xlu0 %v212_v55 }
 0x338   :  { %1161 = vmatmul.msk.bf16.vlgmr.msra.gmra.mxu1 %vm127_vm1, %v1546_v12 }
 0x3a0   :  { %v304_v56 = vpop.xlane.xlu0 %303 }
 0x3a1   :  { %v305_v57 = vsub.f32 %v299_v50, %v304_v56 }
 0x3a3   :  { %v306_v58 = vmul.f32 1.442695, %v305_v57 }
 0x3a5   :  { %1296 = vpow2.f32 %v306_v58  ;;  %v1574_v59 = vpop.f32.mrf.mxu1  ;;  %v1276_v58 = vld [vmem:[%s1793_s5] ss:$0 sm:$0xff] }
 0x3a8   :  { %v214_v4 = vpop.xlane.xlu0 %213 }
 0x3a9   :  { %1298 = vrcp.f32 %v214_v4  ;;  %v1425_v4 = vmov 32.0  }
 0x3ab   :  { %v1297_v60 = vpop.eup %1296 }
 0x3ac   :  { %v308_v61 = vsel %vm127_vm1, %v1297_v60, 0.0 }
 0x3ad   :  { %v277_v62 = vpop.f32.mrf.mxu1  ;;  %309 = vadd.xlane.f32.xlu1 %v308_v61 }
 0x3af   :  { %v1299_v9 = vpop.eup %1298 }
 0x3b0   :  { %v216_v11 = vmul.f32 %v1299_v9, %v1295_v53  ;;  %v1275_v53 = vld [vmem:[%s1791_s3] ss:$0 sm:$0xff] }
 0x3b2   :  { %v217_v15 = vpack.c.bf16 %v216_v11, %v216_v11 }
 0x3b5   :  { %v376_v63 = vpop.f32.mrf.mxu1 }
 0x3b6   :  { %v377_v0 = vadd.f32 %v376_v63, %v84_v24  ;;  %v245_v24 = vsel %vm164_vm2, %v240_v22, 0  ;;  %v1241_v22 = vld [vmem:[#allocation5] sm:$0xff] }
 0x3b7   :  { %254 = vmatpush.bf16.msrb.mxu0 %v245_v24 }
 0x3b8   :  { %v380_v1 = vsel %vm127_vm1, %v377_v0, -inf }
 0x3b9   :  { %381 = vmax.xlane.f32.xlu2 %v380_v1 }
 0x3bb   :  { %350 = vmatpush.bf16.msra.mxu0 %v341_v26 }
 0x3bd   :  { %v378_v3 = vpop.f32.mrf.mxu1 }
 0x3c6   :  { %314 = vrot.lane.b32.xlu1 %v1531_v7, %s1422_s4 }
 0x3d1   :  { %218 = vrot.lane.b32.xlu2 %v1531_v7, %s1423_s25 }
 0x420   :  { %v310_v10 = vpop.xlane.xlu1 %309 }
 0x42c   :  { %v382_v5 = vpop.xlane.xlu2 %381 }
 0x42d   :  { %v383_v6 = vsub.f32 %v377_v0, %v382_v5 }
 0x42f   :  { %v384_v8 = vmul.f32 1.442695, %v383_v6 }
 0x431   :  { %1300 = vpow2.f32 %v384_v8 }
 0x432   :  { %1302 = vrcp.f32 %v310_v10 }
 0x434   :  { %v219_v12 = vpop.permute.xlu2 %218 }
 0x435   :  { %v224_v13 = vsel %vm164_vm2, %v219_v12, 0 }
 0x436   :  { %233 = vmatpush.bf16.msrb.mxu2 %v224_v13 }
 0x437   :  { %v1301_v14 = vpop.eup %1300 }
 0x438   :  { %v315_v16 = vpop.permute.xlu1 %314  ;;  %v386_v17 = vsel %vm127_vm1, %v1301_v14, 0.0  ;;  %v1303_v19 = vpop.eup %1302 }
 0x439   :  { %v320_v18 = vsel %vm164_vm2, %v315_v16, 0  ;;  %387 = vadd.xlane.f32.xlu0 %v386_v17  ;;  %1155 = vmatmul.msk.bf16.vlgmr.msrb.gmra.mxu2 %vm127_vm1, %v217_v15  ;;  %v312_v20 = vmul.f32 %v1303_v19, %v1297_v60  ;;  %v1191_v16 = vld [vmem:[%s1789_s1 + $0x8] sm:$0xff] }
 0x43a   :  { %329 = vmatpush.bf16.msra.mxu2 %v320_v18  ;;  %vm610_vm5 = vcmp.gt.f32.partialorder %v1191_v16, 0.0 }
 0x43b   :  { %v313_v21 = vpack.c.bf16 %v312_v20, %v312_v20  ;;  %v1635_v17 = vsel %vm610_vm5, 0.0, %v1420_v23  ;;  %v1242_v23 = vld [vmem:[#allocation5 + $0x8] sm:$0xff] }
 0x43e   :  { %428 = vmatpush.bf16.msrb.mxu2 %v419_v43 }
 0x449   :  { %1159 = vmatmul.msk.bf16.vlgmr.msra.gmra.mxu2 %vm127_vm1, %v313_v21 }
 0x44d   :  { %392 = vrot.lane.b32.xlu0 %v1531_v7, %s1424_s8 }
 0x4ac   :  { %v388_v27 = vpop.xlane.xlu0 %387 }
 0x4ad   :  { %1304 = vrcp.f32 %v388_v27 }
 0x4ae   :  { %1306 = vrcp.f32 %v1425_v4 }
 0x4b3   :  { %v1305_v28 = vpop.eup %1304 }
 0x4b4   :  { %v390_v31 = vmul.f32 %v1305_v28, %v1301_v14  ;;  %v1307_v5 = vpop.eup %1306 }
 0x4b5   :  { %v445_v6 = vmul.f32 32.0, %v1307_v5  ;;  %vm449_vm4 = vweird.f32 %v1307_v5 }
 0x4b6   :  { %v391_v34 = vpack.c.bf16 %v390_v31, %v390_v31 }
 0x4b7   :  { %v446_v8 = vsub.f32 1.0, %v445_v6 }
 0x4b9   :  { %v447_v9 = vmul.f32 %v1307_v5, %v446_v8 }
 0x4bb   :  { %v448_v10 = vadd.f32 %v1307_v5, %v447_v9 }
 0x4bc   :  { %v235_v29 = vpop.f32.mrf.mxu2 }
 0x4bd   :  { %v239_v30 = vpack.c.bf16 %v235_v29, %v235_v29  ;;  %v1627_v11 = vsel %vm449_vm4, %v1307_v5, %v448_v10 }
 0x4bf   :  { %1156 = vmatmul.msk.bf16.vlgmr.msrb.gmra.mxu0 %vm127_vm1, %v239_v30  ;;  %v393_v7 = vpop.permute.xlu0 %392 }
 0x4c0   :  { %v398_v33 = vsel %vm164_vm2, %v393_v7, 0  ;;  %510 = vmatpush.bf16.msrb.mxu0 %v1242_v23 }
 0x4c1   :  { %407 = vmatpush.bf16.msra.mxu3 %v398_v33 }
 0x4c4   :  { %v237_v36 = vpop.f32.mrf.mxu2  ;;  %1162 = vmatmul.msk.bf16.vlgmr.msra.gmra.mxu3 %vm127_vm1, %v391_v34  ;;  %511 = vmatpush.bf16.msrb.mxu0 %v1241_v22 }
 0x4c5   :  { %642 = vmatpush.bf16.msrb.mxu3 %v1248_v32 }
 0x4c9   :  { %643 = vmatpush.bf16.msrb.mxu3 %v1247_v35  ;;  %v1277_v35 = vld [vmem:[%s1794_s6] ss:$0 sm:$0xff] }
 0x4cc   :  { %v331_v37 = vpop.f32.mrf.mxu2 }
 0x4cd   :  { %v335_v38 = vpack.c.bf16 %v331_v37, %v331_v37 }
 0x4cf   :  { %1160 = vmatmul.msk.bf16.vlgmr.msra.gmra.mxu0 %vm127_vm1, %v335_v38  ;;  %v1278_v38 = vld [vmem:[%s1795_s7] ss:$0 sm:$0xff] }
 0x4d4   :  { %v333_v41 = vpop.f32.mrf.mxu2  ;;  %1200 = vmatmul.msk.bf16.vlgmr.msrb.gmra.mxu3 %vm106_vm0, %v612_v40 }
 0x53c   :  { %v256_v44 = vpop.f32.mrf.mxu0 }
 0x53d   :  { %v276_v48 = vadd.f32 %v1574_v59, %v256_v44 }
 0x544   :  { %v258_v45 = vpop.f32.mrf.mxu0 }
 0x547   :  { %v409_v46 = vpop.f32.mrf.mxu3 }
 0x548   :  { %v413_v47 = vpack.c.bf16 %v409_v46, %v409_v46 }
 0x54a   :  { %1163 = vmatmul.msk.bf16.vlgmr.msrb.gmra.mxu2 %vm127_vm1, %v413_v47  ;;  %v1246_v47 = vld [vmem:[%s1798_s10 + $0x18] sm:$0xff] }
 0x54b   :  { %563 = vmatpush.bf16.msrb.mxu1 %v1246_v47 }
 0x54c   :  { %v352_v49 = vpop.f32.mrf.mxu0 }
 0x54d   :  { %v356_v50 = vadd.f32 %v352_v49, %v276_v48  ;;  %v1245_v48 = vld [vmem:[%s1798_s10 + $0x10] sm:$0xff]  ;;  %v706_v49 = vld [vmem:[#allocation2] sm:$0xf] }
 0x54f   :  { %v411_v51 = vpop.f32.mrf.mxu3  ;;  %564 = vmatpush.bf16.msrb.mxu1 %v1245_v48 }
 0x550   :  { %v1244_v51 = vld [vmem:[%s1798_s10 + $0x8] sm:$0xff] }
 0x553   :  { %565 = vmatpush.bf16.msrb.mxu1 %v1244_v51 }
 0x554   :  { %v354_v52 = vpop.f32.mrf.mxu0 }
 0x555   :  { %v1243_v52 = vld [vmem:[%s1798_s10] sm:$0xff] }
 0x557   :  { %v645_v54 = vpop.f32.mrf.mxu3  ;;  %566 = vmatpush.bf16.msrb.mxu1 %v1243_v52 }
 0x558   :  { %v646_v55 = vadd.f32 %v1275_v53, %v645_v54 }
 0x55a   :  { %v1615_v56 = vpack.c.bf16 %v646_v55, %v646_v55 }
 0x55c   :  { %651 = vrot.lane.b32.xlu0 %v1615_v56, %s1415_s16 }
 0x55f   :  { %v647_v57 = vpop.f32.mrf.mxu3 }
 0x5cd   :  { %v430_v59 = vpop.f32.mrf.mxu2 }
 0x5ce   :  { %v434_v60 = vadd.f32 %v430_v59, %v356_v50  ;;  %v652_v61 = vpop.permute.xlu0 %651  ;;  %v788_v50 = vsel %vm164_vm2, %v706_v49, 0 }
 0x5cf   :  { %v657_v62 = vsel %vm127_vm1, %v652_v61, 0 }
 0x5d0   :  { %v439_v63 = vadd.f32 %v1276_v58, %v434_v60  ;;  %666 = vmatpush.bf16.xpose.msra.mxu2 %v657_v62  ;;  %v1279_v60 = vld [vmem:[%s1797_s9] ss:$0 sm:$0xff] }
 0x5d2   :  { %v440_v0 = vadd.f32 %v439_v63, %v1523_v2 }
 0x5d4   :  { %v441_v1 = vsel %vm106_vm0, %v440_v0, 0.0 }
 0x5d5   :  { %442 = vadd.xlane.f32.xlu0 %v441_v1  ;;  %v432_v3 = vpop.f32.mrf.mxu2 }
 0x5d7   :  { %1201 = vmatmul.msk.bf16.vlgmr.msra.gmra.mxu2 %vm127_vm1, %v1615_v56 }
 0x648   :  { %v443_v12 = vpop.xlane.xlu0 %442 }
 0x649   :  { %v451_v2 = vmul.f32 %v1627_v11, %v443_v12 }
 0x64b   :  { %v452_v13 = vsub.f32 %v440_v0, %v451_v2 }
 0x64d   :  { %v453_v14 = vmul.f32 %v452_v13, %v452_v13 }
 0x64f   :  { %v454_v15 = vsel %vm106_vm0, %v453_v14, 0.0 }
 0x650   :  { %455 = vadd.xlane.f32.xlu1 %v454_v15 }
 0x65a   :  { %v668_v18 = vpop.f32.mrf.mxu2 }
 0x65b   :  { %v669_v19 = vadd.f32 %v668_v18, %v1635_v17 }
 0x65d   :  { %v672_v20 = vsel %vm127_vm1, %v669_v19, -inf }
 0x65e   :  { %673 = vmax.xlane.f32.xlu2 %v672_v20 }
 0x662   :  { %v670_v21 = vpop.f32.mrf.mxu2 }
 0x669   :  { %707 = vrot.lane.b32.xlu1 %v1615_v56, %s1418_s19 }
 0x676   :  { %684 = vrot.lane.b32.xlu2 %v1615_v56, %s1411_s21 }
 0x67e   :  { %805 = vrot.lane.b32.xlu2 %v1615_v56, %s1419_s20 }
 0x686   :  { %883 = vrot.lane.b32.xlu2 %v1615_v56, %s1414_s15 }
 0x6c3   :  { %v456_v24 = vpop.xlane.xlu1 %455 }
 0x6c4   :  { %v457_v25 = vmul.f32 %v456_v24, %v1627_v11 }
 0x6c6   :  { %v458_v26 = vadd.f32 1e-05, %v457_v25 }
 0x6c8   :  { %1308 = vrsqrt.f32 %v458_v26  ;;  %vm465_vm7 = vweird.f32 %v458_v26 }
 0x6ce   :  { %v1309_v27 = vpop.eup %1308 }
 0x6cf   :  { %v460_v28 = vmul.f32 %v1309_v27, %v458_v26  ;;  %vm466_vm6 = vweird.f32 %v1309_v27 }
 0x6d0   :  { %vm467_vm8 = vmor %vm465_vm7, %vm466_vm6 }
 0x6d1   :  { %v461_v29 = vmul.f32 %v1309_v27, %v460_v28  ;;  %v674_v30 = vpop.xlane.xlu2 %673 }
 0x6d2   :  { %v675_v31 = vsub.f32 %v669_v19, %v674_v30 }
 0x6d3   :  { %v462_v32 = vmul.f32 0.5, %v461_v29 }
 0x6d4   :  { %v676_v7 = vmul.f32 1.442695, %v675_v31 }
 0x6d5   :  { %v463_v33 = vsub.f32 1.5, %v462_v32 }
 0x6d6   :  { %1310 = vpow2.f32 %v676_v7 }
 0x6d7   :  { %v464_v34 = vmul.f32 %v1309_v27, %v463_v33 }
 0x6d9   :  { %v468_v36 = vsel %vm467_vm8, %v1309_v27, %v464_v34  ;;  %v685_v37 = vpop.permute.xlu2 %684 }
 0x6da   :  { %v469_v40 = vmul.f32 %v468_v36, %v452_v13  ;;  %v690_v41 = vsel %vm164_vm2, %v685_v37, 0 }
 0x6db   :  { %699 = vmatpush.bf16.msra.mxu0 %v690_v41  ;;  %v708_v8 = vpop.permute.xlu1 %707 }
 0x6dc   :  { %v1311_v42 = vpop.eup %1310  ;;  %v474_v43 = vmul.f32 %v1277_v35, %v469_v40 }
 0x6dd   :  { %v678_v44 = vsel %vm127_vm1, %v1311_v42, 0.0 }
 0x6de   :  { %v1656_v45 = vadd.f32 %v1278_v38, %v474_v43  ;;  %679 = vadd.xlane.f32.xlu0 %v678_v44 }
 0x6e0   :  { %v480_v46 = vpack.c.bf16 %v1656_v45, %v1656_v45 }
 0x6e1   :  { %v806_v53 = vpop.permute.xlu2 %805 }
 0x6e2   :  { %1172 = vmatmul.msk.bf16.vlgmr.msrb.gmra.mxu0 %vm106_vm0, %v480_v46  ;;  %v811_v5 = vsel %vm127_vm1, %v806_v53, 0 }
 0x6e3   :  { %797 = vmatpush.bf16.msrb.mxu0 %v788_v50 }
 0x6e9   :  { %v884_v58 = vpop.permute.xlu2 %883 }
 0x6ea   :  { %v889_v61 = vsel %vm127_vm1, %v884_v58, 0 }
 0x6f2   :  { %709 = vrot.lane.b32.xlu0 %v1615_v56, %s1416_s17 }
 0x6fa   :  { %803 = vrot.lane.b32.xlu0 %v1615_v56, %s1421_s24 }
 0x702   :  { %881 = vrot.lane.b32.xlu0 %v1615_v56, %s1417_s18 }
 0x751   :  { %v680_v54 = vpop.xlane.xlu0 %679 }
 0x752   :  { %1312 = vrcp.f32 %v680_v54 }
 0x758   :  { %v1313_v55 = vpop.eup %1312 }
 0x759   :  { %v682_v57 = vmul.f32 %v1313_v55, %v1311_v42 }
 0x75b   :  { %v683_v59 = vpack.c.bf16 %v682_v57, %v682_v57 }
 0x75d   :  { %1202 = vmatmul.msk.bf16.vlgmr.msra.gmra.mxu0 %vm127_vm1, %v683_v59  ;;  %v1280_v59 = vld [vmem:[%s1799_s11] ss:$0 sm:$0xff] }
 0x75e   :  { %898 = vmatpush.bf16.xpose.msra.mxu0 %v889_v61 }
 0x75f   :  { %v513_v62 = vpop.f32.mrf.mxu0 }
 0x760   :  { %v514_v63 = vadd.f32 %v1279_v60, %v513_v62 }
 0x762   :  { %v517_v0 = vmax.f32 %v514_v63, 0.0  ;;  %v764_v63 = vld [vmem:[#allocation2 + $0x4] sm:$0xf] }
 0x764   :  { %v518_v1 = vpack.c.bf16 %v517_v0, %v517_v0  ;;  %v710_v3 = vpop.permute.xlu0 %709 }
 0x765   :  { %v715_v4 = vsel %vm127_vm1, %v710_v3, 0 }
 0x766   :  { %1189 = vmatmul.msk.bf16.vlgmr.msrb.gmra.mxu1 %vm555_vm9, %v518_v1  ;;  %v860_v1 = vld [vmem:[#allocation2 + $0x8] sm:$0xf] }
 0x767   :  { %724 = vmatpush.bf16.xpose.msra.mxu1 %v715_v4  ;;  %v515_v6 = vpop.f32.mrf.mxu0  ;;  %v865_v3 = vsel %vm164_vm2, %v860_v1, 0 }
 0x76c   :  { %v804_v9 = vpop.permute.xlu0 %803 }
 0x76f   :  { %820 = vmatpush.bf16.xpose.msrb.mxu1 %v811_v5 }
 0x774   :  { %v882_v15 = vpop.permute.xlu0 %881 }
 0x776   :  { %1203 = vmatmul.msk.bf16.vlgmr.msra.gmra.mxu1 %vm127_vm1, %v708_v8 }
 0x786   :  { %1207 = vmatmul.msk.bf16.vlgmr.msrb.gmra.mxu1 %vm127_vm1, %v804_v9 }
 0x7da   :  { %v701_v10 = vpop.f32.mrf.mxu0 }
 0x7db   :  { %v705_v12 = vpack.c.bf16 %v701_v10, %v701_v10 }
 0x7dd   :  { %1206 = vmatmul.msk.bf16.vlgmr.msrb.gmra.mxu0 %vm127_vm1, %v705_v12 }
 0x7e2   :  { %v703_v2 = vpop.f32.mrf.mxu0 }
 0x7e3   :  { %v1691_v13 = vpop.f32.mrf.mxu1 }
 0x7e4   :  { %v569_v60 = vadd.f32 %v1280_v59, %v1691_v13 }
 0x7e6   :  { %v572_v61 = vadd.f32 %v569_v60, %v1656_v45 }
 0x7e8   :  { %v573_v62 = vsel %vm106_vm0, %v572_v61, 0.0 }
 0x7eb   :  { %v570_v14 = vpop.f32.mrf.mxu1 }
 0x7ed   :  { %1210 = vmatmul.msk.bf16.vlgmr.msra.gmra.mxu0 %vm127_vm1, %v882_v15  ;;  %v938_v15 = vld [vmem:[#allocation2 + $0xc] sm:$0xf] }
 0x7f3   :  { %v726_v16 = vpop.f32.mrf.mxu1 }
 0x7f4   :  { %v727_v18 = vadd.f32 %v726_v16, %v1635_v17  ;;  %v943_v16 = vsel %vm164_vm2, %v938_v15, 0  ;;  %v1252_v15 = vld [vmem:[%s1798_s10 + $0x8] sm:$0xff] }
 0x7f6   :  { %v730_v19 = vsel %vm127_vm1, %v727_v18, -inf }
 0x7f7   :  { %731 = vmax.xlane.f32.xlu1 %v730_v19 }
 0x7fb   :  { %v728_v20 = vpop.f32.mrf.mxu1 }
 0x803   :  { %v822_v21 = vpop.f32.mrf.mxu1 }
 0x804   :  { %v823_v23 = vadd.f32 %v822_v21, %v1635_v17 }
 0x806   :  { %v826_v22 = vsel %vm127_vm1, %v823_v23, -inf }
 0x807   :  { %827 = vmax.xlane.f32.xlu2 %v826_v22 }
 0x80b   :  { %v824_v24 = vpop.f32.mrf.mxu1 }
 0x81f   :  { %742 = vrot.lane.b32.xlu2 %v1615_v56, %s1423_s25 }
 0x85a   :  { %v1700_v25 = vpop.f32.mrf.mxu0 }
 0x862   :  { %v801_v26 = vpop.f32.mrf.mxu0 }
 0x86a   :  { %v732_v27 = vpop.xlane.xlu1 %731  ;;  %v900_v28 = vpop.f32.mrf.mxu0 }
 0x86b   :  { %v733_v29 = vsub.f32 %v727_v18, %v732_v27  ;;  %v901_v30 = vadd.f32 %v900_v28, %v1635_v17  ;;  %v1281_v28 = vld [vmem:[%s1793_s5] ss:$0 sm:$0xff]  ;;  %s1129_s5 = sshll.u32 %s1802_s14, 4  ;;  %s1130_s5 = int_to_ptr.hbm [resolvable:$true] %s1129_s5 }
 0x86d   :  { %v734_v31 = vmul.f32 1.442695, %v733_v29  ;;  %v904_v32 = vsel %vm127_vm1, %v901_v30, -inf }
 0x86e   :  { %905 = vmax.xlane.f32.xlu0 %v904_v32 }
 0x86f   :  { %1314 = vpow2.f32 %v734_v31 }
 0x872   :  { %v902_v7 = vpop.f32.mrf.mxu0 }
 0x875   :  { %v1315_v33 = vpop.eup %1314 }
 0x876   :  { %v736_v34 = vsel %vm127_vm1, %v1315_v33, 0.0 }
 0x877   :  { %737 = vadd.xlane.f32.xlu1 %v736_v34 }
 0x87a   :  { %v828_v35 = vpop.xlane.xlu2 %827 }
 0x87b   :  { %v829_v36 = vsub.f32 %v823_v23, %v828_v35 }
 0x87d   :  { %v830_v37 = vmul.f32 1.442695, %v829_v36 }
 0x87f   :  { %1316 = vpow2.f32 %v830_v37 }
 0x882   :  { %v743_v38 = vpop.permute.xlu2 %742 }
 0x883   :  { %v748_v40 = vsel %vm164_vm2, %v743_v38, 0 }
 0x884   :  { %757 = vmatpush.bf16.msra.mxu3 %v748_v40 }
 0x885   :  { %v1317_v41 = vpop.eup %1316 }
 0x886   :  { %v832_v17 = vsel %vm127_vm1, %v1317_v41, 0.0 }
 0x887   :  { %833 = vadd.xlane.f32.xlu0 %v832_v17 }
 0x890   :  { %838 = vrot.lane.b32.xlu1 %v1615_v56, %s1422_s4  ;;  %s1426_s4 = smov [#allocation7]  }
 0x891   :  { %s1127_s25 = sshll.u32 %s1426_s4, 4  ;;  %s1128_s25 = int_to_ptr.vmem [resolvable:$true] %s1127_s25 }
 0x8e1   :  { %v906_v42 = vpop.xlane.xlu0 %905 }
 0x8e2   :  { %v907_v43 = vsub.f32 %v901_v30, %v906_v42 }
 0x8e4   :  { %v908_v44 = vmul.f32 1.442695, %v907_v43  ;;  %v1249_v43 = vld [vmem:[#allocation5] sm:$0xff] }
 0x8e6   :  { %1318 = vpow2.f32 %v908_v44 }
 0x8ea   :  { %v738_v46 = vpop.xlane.xlu1 %737 }
 0x8eb   :  { %1320 = vrcp.f32 %v738_v46 }
 0x8ec   :  { %v1319_v47 = vpop.eup %1318 }
 0x8ed   :  { %v910_v48 = vsel %vm127_vm1, %v1319_v47, 0.0 }
 0x8ee   :  { %911 = vadd.xlane.f32.xlu0 %v910_v48  ;;  %v1254_v48 = vld [vmem:[%s1798_s10 + $0x18] sm:$0xff] }
 0x8ef   :  { %1079 = vmatpush.bf16.msrb.mxu0 %v1254_v48 }
 0x8f1   :  { %v1321_v49 = vpop.eup %1320 }
 0x8f2   :  { %v740_v50 = vmul.f32 %v1321_v49, %v1315_v33  ;;  %v1253_v49 = vld [vmem:[%s1798_s10 + $0x10] sm:$0xff] }
 0x8f3   :  { %1080 = vmatpush.bf16.msrb.mxu0 %v1253_v49 }
 0x8f4   :  { %v741_v51 = vpack.c.bf16 %v740_v50, %v740_v50 }
 0x8f6   :  { %1204 = vmatmul.msk.bf16.vlgmr.msra.gmra.mxu3 %vm127_vm1, %v741_v51 }
 0x8f7   :  { %1081 = vmatpush.bf16.msrb.mxu0 %v1252_v15 }
 0x8fa   :  { %v834_v52 = vpop.xlane.xlu0 %833 }
 0x8fb   :  { %1322 = vrcp.f32 %v834_v52 }
 0x901   :  { %v1323_v53 = vpop.eup %1322 }
 0x902   :  { %v836_v54 = vmul.f32 %v1323_v53, %v1317_v41  ;;  %v839_v55 = vpop.permute.xlu1 %838  ;;  %916 = vrot.lane.b32.xlu0 %v1615_v56, %s1424_s8  ;;  %v769_v56 = vsel %vm164_vm2, %v764_v63, 0 }
 0x903   :  { %v844_v57 = vsel %vm164_vm2, %v839_v55, 0  ;;  %778 = vmatpush.bf16.msrb.mxu2 %v769_v56 }
 0x904   :  { %v837_v58 = vpack.c.bf16 %v836_v54, %v836_v54  ;;  %853 = vmatpush.bf16.msrb.mxu3 %v844_v57 }
 0x907   :  { %1208 = vmatmul.msk.bf16.vlgmr.msrb.gmra.mxu3 %vm127_vm1, %v837_v58  ;;  %874 = vmatpush.bf16.msra.mxu2 %v865_v3 }
 0x908   :  { %952 = vmatpush.bf16.msra.mxu3 %v943_v16  ;;  %v1251_v16 = vld [vmem:[%s1798_s10] sm:$0xff] }
 0x909   :  { %1082 = vmatpush.bf16.msrb.mxu0 %v1251_v16 }
 0x92c   :  { %574 = vadd.xlane.f32.xlu0 %v573_v62  ;;  %v1282_v62 = vld [vmem:[%s1794_s6] ss:$0 sm:$0xff] }
 0x961   :  { %v912_v0 = vpop.xlane.xlu0 %911 }
 0x962   :  { %1324 = vrcp.f32 %v912_v0  ;;  %v1283_v0 = vld [vmem:[%s1795_s7] ss:$0 sm:$0xff] }
 0x968   :  { %v1325_v4 = vpop.eup %1324 }
 0x969   :  { %v914_v5 = vmul.f32 %v1325_v4, %v1319_v47 }
 0x96b   :  { %v915_v45 = vpack.c.bf16 %v914_v5, %v914_v5 }
 0x974   :  { %v917_v6 = vpop.permute.xlu0 %916 }
 0x975   :  { %v922_v8 = vsel %vm164_vm2, %v917_v6, 0 }
 0x976   :  { %931 = vmatpush.bf16.msra.mxu1 %v922_v8 }
 0x979   :  { %v759_v9 = vpop.f32.mrf.mxu3  ;;  %1211 = vmatmul.msk.bf16.vlgmr.msra.gmra.mxu1 %vm127_vm1, %v915_v45  ;;  %v1284_v45 = vld [vmem:[%s1800_s12] ss:$0 sm:$0xff] }
 0x97a   :  { %v763_v10 = vpack.c.bf16 %v759_v9, %v759_v9 }
 0x97c   :  { %1205 = vmatmul.msk.bf16.vlgmr.msrb.gmra.mxu2 %vm127_vm1, %v763_v10 }
 0x981   :  { %v761_v12 = vpop.f32.mrf.mxu3 }
 0x982   :  { %v1285_v12 = vld [vmem:[%s1801_s13] ss:$0 sm:$0xff] }
 0x98a   :  { %v855_v2 = vpop.f32.mrf.mxu3 }
 0x98b   :  { %v859_v13 = vpack.c.bf16 %v855_v2, %v855_v2 }
 0x98d   :  { %1209 = vmatmul.msk.bf16.vlgmr.msra.gmra.mxu2 %vm127_vm1, %v859_v13 }
 0x992   :  { %v857_v14 = vpop.f32.mrf.mxu3 }
 0x99f   :  { %v575_v34 = vpop.xlane.xlu0 %574 }
 0x9a0   :  { %v576_v36 = vmul.f32 %v575_v34, %v1627_v11 }
 0x9a2   :  { %v577_v40 = vsub.f32 %v572_v61, %v576_v36 }
 0x9a4   :  { %v578_v17 = vmul.f32 %v577_v40, %v577_v40 }
 0x9a6   :  { %v579_v42 = vsel %vm106_vm0, %v578_v17, 0.0 }
 0x9f6   :  { %v933_v18 = vpop.f32.mrf.mxu1 }
 0x9f7   :  { %v937_v19 = vpack.c.bf16 %v933_v18, %v933_v18  ;;  %v1286_v18 = vld [vmem:[%s1797_s9] ss:$0 sm:$0xff] }
 0x9f9   :  { %1212 = vmatmul.msk.bf16.vlgmr.msra.gmra.mxu3 %vm127_vm1, %v937_v19 }
 0x9fe   :  { %v935_v20 = vpop.f32.mrf.mxu1 }
 0x9ff   :  { %v780_v21 = vpop.f32.mrf.mxu2 }
 0xa00   :  { %v800_v22 = vadd.f32 %v1700_v25, %v780_v21 }
 0xa07   :  { %v782_v23 = vpop.f32.mrf.mxu2 }
 0xa10   :  { %v876_v24 = vpop.f32.mrf.mxu2 }
 0xa11   :  { %v880_v26 = vadd.f32 %v876_v24, %v800_v22  ;;  %v1287_v24 = vld [vmem:[%s1799_s11] ss:$0 sm:$0xff] }
 0xa18   :  { %v878_v27 = vpop.f32.mrf.mxu2 }
 0xa7c   :  { %v954_v29 = vpop.f32.mrf.mxu3 }
 0xa7d   :  { %v958_v30 = vadd.f32 %v954_v29, %v880_v26 }
 0xa7f   :  { %v963_v31 = vadd.f32 %v1281_v28, %v958_v30 }
 0xa81   :  { %v964_v32 = vadd.f32 %v1603_v39, %v963_v31  ;;  %v1250_v39 = vld [vmem:[#allocation5 + $0x8] sm:$0xff] }
 0xa82   :  { %1027 = vmatpush.bf16.msrb.mxu2 %v1250_v39  ;;  %v1288_v39 = vld [vmem:[%s1800_s12] ss:$0 sm:$0xff]  ;;  %s1427_s12 = smov 128  }
 0xa83   :  { %v965_v7 = vsel %vm106_vm0, %v964_v32, 0.0 }
 0xa84   :  { %966 = vadd.xlane.f32.xlu2 %v965_v7  ;;  %v956_v33 = vpop.f32.mrf.mxu3 }
 0xa86   :  { %1028 = vmatpush.bf16.msrb.mxu2 %v1249_v43 }
 0xaf7   :  { %v967_v35 = vpop.xlane.xlu2 %966 }
 0xaf8   :  { %v968_v25 = vmul.f32 %v967_v35, %v1627_v11 }
 0xafa   :  { %v969_v37 = vsub.f32 %v964_v32, %v968_v25 }
 0xafc   :  { %v970_v38 = vmul.f32 %v969_v37, %v969_v37 }
 0xafe   :  { %v971_v41 = vsel %vm106_vm0, %v970_v38, 0.0 }
 0xaff   :  { %972 = vadd.xlane.f32.xlu1 %v971_v41 }
 0xb07   :  { %580 = vadd.xlane.f32.xlu1 %v579_v42 }
 0xb72   :  { %v973_v44 = vpop.xlane.xlu1 %972 }
 0xb73   :  { %v974_v46 = vmul.f32 %v973_v44, %v1627_v11 }
 0xb75   :  { %v975_v47 = vadd.f32 1e-05, %v974_v46 }
 0xb77   :  { %1326 = vrsqrt.f32 %v975_v47  ;;  %vm982_vm11 = vweird.f32 %v975_v47 }
 0xb7a   :  { %v581_v50 = vpop.xlane.xlu1 %580 }
 0xb7b   :  { %v582_v51 = vmul.f32 %v581_v50, %v1627_v11 }
 0xb7d   :  { %v1327_v52 = vpop.eup %1326  ;;  %v583_v53 = vadd.f32 1e-05, %v582_v51 }
 0xb7e   :  { %v977_v54 = vmul.f32 %v1327_v52, %v975_v47  ;;  %vm983_vm10 = vweird.f32 %v1327_v52 }
 0xb7f   :  { %1328 = vrsqrt.f32 %v583_v53  ;;  %vm984_vm12 = vmor %vm982_vm11, %vm983_vm10  ;;  %vm590_vm14 = vweird.f32 %v583_v53 }
 0xb80   :  { %v978_v55 = vmul.f32 %v1327_v52, %v977_v54 }
 0xb82   :  { %v979_v57 = vmul.f32 0.5, %v978_v55 }
 0xb84   :  { %v980_v58 = vsub.f32 1.5, %v979_v57 }
 0xb85   :  { %v1329_v59 = vpop.eup %1328 }
 0xb86   :  { %v981_v60 = vmul.f32 %v1327_v52, %v980_v58  ;;  %v585_v61 = vmul.f32 %v1329_v59, %v583_v53  ;;  %vm591_vm13 = vweird.f32 %v1329_v59 }
 0xb87   :  { %vm592_vm15 = vmor %vm590_vm14, %vm591_vm13 }
 0xb88   :  { %v985_v63 = vsel %vm984_vm12, %v1327_v52, %v981_v60  ;;  %v586_v56 = vmul.f32 %v1329_v59, %v585_v61 }
 0xb89   :  { %v986_v1 = vmul.f32 %v985_v63, %v969_v37 }
 0xb8a   :  { %v587_v3 = vmul.f32 0.5, %v586_v56 }
 0xb8b   :  { %v991_v4 = vmul.f32 %v1282_v62, %v986_v1 }
 0xb8c   :  { %v588_v5 = vsub.f32 1.5, %v587_v3 }
 0xb8d   :  { %v996_v6 = vadd.f32 %v1283_v0, %v991_v4 }
 0xb8e   :  { %v589_v8 = vmul.f32 %v1329_v59, %v588_v5 }
 0xb8f   :  { %v997_v9 = vpack.c.bf16 %v996_v6, %v996_v6 }
 0xb90   :  { %v593_v10 = vsel %vm592_vm15, %v1329_v59, %v589_v8 }
 0xb91   :  { %v594_v2 = vmul.f32 %v593_v10, %v577_v40  ;;  %1221 = vmatmul.msk.bf16.vlgmr.msrb.gmra.mxu2 %vm106_vm0, %v997_v9 }
 0xb93   :  { %v599_v13 = vmul.f32 %v1284_v45, %v594_v2 }
 0xb95   :  { %v604_v14 = vadd.f32 %v1285_v12, %v599_v13 }
 0xb97   :  { %605 = vst.msk [vmem:[#allocation7] sm:$0xff] %vm106_vm0, %v604_v14 }
 0xc14   :  { %v1030_v19 = vpop.f32.mrf.mxu2 }
 0xc15   :  { %v1031_v20 = vadd.f32 %v1286_v18, %v1030_v19 }
 0xc17   :  { %v1034_v21 = vmax.f32 %v1031_v20, 0.0 }
 0xc19   :  { %v1035_v23 = vpack.c.bf16 %v1034_v21, %v1034_v21 }
 0xc1b   :  { %1238 = vmatmul.msk.bf16.vlgmr.msrb.gmra.mxu0 %vm555_vm9, %v1035_v23 }
 0xc1c   :  { %v1032_v22 = vpop.f32.mrf.mxu2 }
 0xc98   :  { %v1084_v26 = vpop.f32.mrf.mxu0 }
 0xc99   :  { %v1085_v27 = vadd.f32 %v1287_v24, %v1084_v26 }
 0xc9b   :  { %v1088_v28 = vadd.f32 %v1085_v27, %v996_v6 }
 0xc9d   :  { %v1089_v29 = vsel %vm106_vm0, %v1088_v28, 0.0 }
 0xc9e   :  { %1090 = vadd.xlane.f32.xlu2 %v1089_v29 }
 0xca0   :  { %v1086_v30 = vpop.f32.mrf.mxu0 }
 0xd11   :  { %v1091_v31 = vpop.xlane.xlu2 %1090 }
 0xd12   :  { %v1092_v32 = vmul.f32 %v1091_v31, %v1627_v11 }
 0xd14   :  { %v1093_v7 = vsub.f32 %v1088_v28, %v1092_v32 }
 0xd16   :  { %v1094_v33 = vmul.f32 %v1093_v7, %v1093_v7 }
 0xd18   :  { %v1095_v34 = vsel %vm106_vm0, %v1094_v33, 0.0 }
 0xd19   :  { %1096 = vadd.xlane.f32.xlu2 %v1095_v34 }
 0xd8c   :  { %v1097_v35 = vpop.xlane.xlu2 %1096 }
 0xd8d   :  { %v1098_v25 = vmul.f32 %v1097_v35, %v1627_v11  ;;  %v1289_v11 = vld [vmem:[%s1801_s13] ss:$0 sm:$0xff] }
 0xd8f   :  { %v1099_v36 = vadd.f32 1e-05, %v1098_v25 }
 0xd91   :  { %1330 = vrsqrt.f32 %v1099_v36  ;;  %vm1106_vm2 = vweird.f32 %v1099_v36 }
 0xd97   :  { %v1331_v37 = vpop.eup %1330 }
 0xd98   :  { %v1101_v38 = vmul.f32 %v1331_v37, %v1099_v36  ;;  %vm1107_vm1 = vweird.f32 %v1331_v37 }
 0xd99   :  { %vm1108_vm3 = vmor %vm1106_vm2, %vm1107_vm1 }
 0xd9a   :  { %v1102_v40 = vmul.f32 %v1331_v37, %v1101_v38 }
 0xd9c   :  { %v1103_v41 = vmul.f32 0.5, %v1102_v40 }
 0xd9e   :  { %v1104_v17 = vsub.f32 1.5, %v1103_v41 }
 0xda0   :  { %v1105_v42 = vmul.f32 %v1331_v37, %v1104_v17 }
 0xda2   :  { %v1109_v43 = vsel %vm1108_vm3, %v1331_v37, %v1105_v42 }
 0xda3   :  { %v1110_v44 = vmul.f32 %v1109_v43, %v1093_v7 }
 0xda5   :  { %v1115_v46 = vmul.f32 %v1288_v39, %v1110_v44 }
 0xda7   :  { %v1120_v47 = vadd.f32 %v1289_v11, %v1115_v46 }
 0xda9   :  { %1122 = vst.msk [vmem:[#allocation7 + $0x8] sm:$0xff] %vm106_vm0, %v1120_v47 }
 0xdaa   :  { %1135 = dma.vmem_to_hbm [thread:$0]  %s1128_s25, 256, %s1130_s5, [#allocation4], %s1427_s12, %s1427_s12, %s1428_s23  }
 0xdab   :  { %1408 = dma.done.wait [#allocation4], 256  }
 0xdac   :  { %1409 = vsyncadd [#allocation4], 4294967040 }
 0xdad   :  { %1140 = vsyncpa [#allocation3], 1 }
 0xdae   :  { %1141 = vsyncpa [#allocation6], 1 }
 0xdaf   :  { %1142 = vsyncpa [#allocation4], 1 }

</bundles_post_ra>
